<compile_context>
chip_gen: v7x
topology: tpu7x:2x2x1
jax: 0.10.0
libtpu: 0.0.40
codegen_flags: <defaults>
</compile_context>

<pallas_src>
import jax
import jax.numpy as jnp
from jax.experimental import pallas as pl
from jax.experimental.pallas import tpu as pltpu


def _round_up(x, m):
    return (x + m - 1) // m * m


def _lstm_classifier_kernel(x_ref,       # (T*Bp, Dp)  f32, time-major, batch-padded
                            wih0_ref,    # (Dp,  Gp)   f32  layer-0 input proj
                            whh0_ref,    # (H,   Gp)   bf16 layer-0 recurrent
                            b0_ref,      # (1,   Gp)   f32  b_ih0 + b_hh0
                            w1_ref,      # (2H,  Gp)   bf16 layer-1 [W_ih; W_hh] fused
                            b1_ref,      # (1,   Gp)   f32  b_ih1 + b_hh1
                            wc_ref,      # (H,   Cp)   f32  classifier weight
                            bc_ref,      # (1,   Cp)   f32  classifier bias
                            out_ref,     # (Bp,  Cp)   f32
                            xg_ref):     # scratch (T*Bp, Gp) f32
    TB, Gp = xg_ref.shape
    H = whh0_ref.shape[0]
    Bp = out_ref.shape[0]
    T = TB // Bp
    w_dtype = whh0_ref.dtype

    # ---- preamble (runs once, off the serial critical path) ---------------
    # Hoisted layer-0 input projection for all timesteps: one big MXU matmul
    # instead of T tiny ones inside the recurrence; bias folded in here.
    xg_ref[...] = (jnp.dot(x_ref[...], wih0_ref[...],
                           preferred_element_type=jnp.float32)
                   + b0_ref[...])

    # Loop invariants hoisted once (the loop is unrolled and JAX does not CSE
    # broadcast_in_dim / iota, so emitting these inside would replicate them).
    b1 = jnp.broadcast_to(b1_ref[...], (Bp, Gp))
    lane = jax.lax.broadcasted_iota(jnp.int32, (Bp, Gp), 1)
    g_lane = (lane >= 2 * H) & (lane < 3 * H)   # lanes of the "g" (cell) gate

    def gates_to_hc(g, c):
        # Single EUP tanh over the whole gate vreg:
        #   i/f/o lanes: sigmoid(x) = 0.5*tanh(0.5*x) + 0.5
        #   g lanes    : tanh(x)
        pre = jnp.where(g_lane, g, 0.5 * g)
        t = jnp.tanh(pre)
        act = jnp.where(g_lane, t, 0.5 * t + 0.5)
        i = act[:, 0 * H:1 * H]
        f = act[:, 1 * H:2 * H]
        gg = act[:, 2 * H:3 * H]
        o = act[:, 3 * H:4 * H]
        c_new = f * c + i * gg
        h_new = o * jnp.tanh(c_new)              # second (and last) EUP push
        return h_new, c_new

    def l0_gates(t, h1):
        # Recurrent weight indexed from the ref inside the dot (not held live
        # across the whole unrolled loop) so Mosaic may rematerialize the load.
        return xg_ref[pl.ds(t * Bp, Bp), :] + jnp.dot(
            h1.astype(w_dtype), whh0_ref[...],
            preferred_element_type=jnp.float32)

    def l1_gates(h1, h2):
        # Layer-1 input + recurrent matmuls fused into one MXU pass.
        lhs = jnp.concatenate([h1, h2], axis=1).astype(w_dtype)
        return jnp.dot(lhs, w1_ref[...],
                       preferred_element_type=jnp.float32) + b1

    zeros = jnp.zeros((Bp, H), jnp.float32)
    h1, c1, h2, c2 = zeros, zeros, zeros, zeros

    # ---- recurrence: fully unrolled, skewed wavefront ----------------------
    # t = 0, layer 0: h1_init == 0, so the recurrent term vanishes exactly.
    h1, c1 = gates_to_hc(xg_ref[pl.ds(0, Bp), :], c1)
    for t in range(T - 1):
        # layer-1@t and layer-0@(t+1) only need h1@t => data independent;
        # emit their matmul + EUP chains adjacently so they interleave.
        g1 = l1_gates(h1, h2)        # layer 1 @ t
        g0 = l0_gates(t + 1, h1)     # layer 0 @ t+1
        h2, c2 = gates_to_hc(g1, c2)
        h1, c1 = gates_to_hc(g0, c1)
    h2, c2 = gates_to_hc(l1_gates(h1, h2), c2)   # layer 1 @ T-1

    # ---- classifier on the last-timestep hidden state of the top layer ----
    out_ref[...] = (jnp.dot(h2, wc_ref[...], preferred_element_type=jnp.float32)
                    + bc_ref[...])


def rnn_forward(x, params):
    """x: (B, T, D) float32 (batch_first, like the PyTorch module)."""
    (wih0, whh0, b0, wih1, whh1, b1, wc, bc) = params
    B, T, D = x.shape
    H = whh0.shape[0]
    C = wc.shape[1]

    G = 4 * H
    Gp = _round_up(G, 128)    # gate vector as ONE lane block (4H == 128 here: no pad)
    Bp = _round_up(B, 8)      # f32 sublane tile
    Cp = _round_up(C, 128)    # lane-dense output store
    Dp = _round_up(D, 8)      # aligned K for the hoisted projection

    # --- one-time layout plumbing / zero padding (outside the kernel) ------
    pad_g = ((0, 0), (0, Gp - G))
    wih0_p = jnp.pad(wih0, ((0, Dp - D), (0, Gp - G)))                    # (Dp, Gp) f32
    b0_p = jnp.pad(b0, pad_g)                                             # (1,  Gp) f32
    # Recurrent matmul inputs in bf16 (single MXU pass / halved weight loads);
    # accumulation and all gate/state math stay f32.
    whh0_p = jnp.pad(whh0, pad_g).astype(jnp.bfloat16)                    # (H,  Gp) bf16
    w1_f = jnp.pad(jnp.concatenate([wih1, whh1], axis=0),
                   pad_g).astype(jnp.bfloat16)                            # (2H, Gp) bf16
    b1_p = jnp.pad(b1, pad_g)                                             # (1,  Gp) f32
    wc_p = jnp.pad(wc, ((0, 0), (0, Cp - C)))                             # (H,  Cp) f32
    bc_p = jnp.pad(bc, ((0, 0), (0, Cp - C)))                             # (1,  Cp) f32

    # time-major, batch padded to the sublane tile, flattened so the hoisted
    # input projection is one (T*Bp, Dp) @ (Dp, Gp) matmul.
    x_tm = jnp.transpose(x, (1, 0, 2))                            # (T, B, D)
    x_tm = jnp.pad(x_tm, ((0, 0), (0, Bp - B), (0, Dp - D)))      # (T, Bp, Dp)
    x2d = x_tm.reshape(T * Bp, Dp)                                # (T*Bp, Dp)

    flops = (2 * T * Bp * Dp * Gp            # hoisted input projection
             + T * 2 * Bp * H * Gp           # layer-0 recurrent matmuls
             + T * 2 * Bp * (2 * H) * Gp     # layer-1 fused matmuls
             + 2 * Bp * H * Cp)              # classifier
    transcendentals = T * 2 * Bp * (Gp + H)
    bytes_accessed = (4 * (x2d.size + wih0_p.size + b0_p.size + b1_p.size
                           + wc_p.size + bc_p.size + Bp * Cp)
                      + 2 * (whh0_p.size + w1_f.size))

    vmem = pl.BlockSpec(memory_space=pltpu.MemorySpace.VMEM)
    out_p = pl.pallas_call(
        _lstm_classifier_kernel,
        out_shape=jax.ShapeDtypeStruct((Bp, Cp), jnp.float32),
        in_specs=[vmem] * 8,
        out_specs=vmem,
        scratch_shapes=[pltpu.VMEM((T * Bp, Gp), jnp.float32)],
        cost_estimate=pl.CostEstimate(flops=flops,
                                      transcendentals=transcendentals,
                                      bytes_accessed=bytes_accessed),
    )(x2d, wih0_p, whh0_p, b0_p, w1_f, b1_p, wc_p, bc_p)
    return out_p[:B, :C]


def init_params(key, in_dim, hidden_dim, n_class):
    """Deterministic synthetic parameters (PyTorch-style, pre-transposed)."""
    ks = jax.random.split(key, 10)
    s = 0.1
    # layer 0: W_ih (4H, D) -> stored (D, 4H); W_hh (4H, H) -> stored (H, 4H)
    wih0 = s * jax.random.normal(ks[0], (in_dim, 4 * hidden_dim), jnp.float32)
    whh0 = s * jax.random.normal(ks[1], (hidden_dim, 4 * hidden_dim), jnp.float32)
    b0 = s * jax.random.normal(ks[2], (1, 4 * hidden_dim), jnp.float32)   # b_ih + b_hh folded
    # layer 1
    wih1 = s * jax.random.normal(ks[3], (hidden_dim, 4 * hidden_dim), jnp.float32)
    whh1 = s * jax.random.normal(ks[4], (hidden_dim, 4 * hidden_dim), jnp.float32)
    b1 = s * jax.random.normal(ks[5], (1, 4 * hidden_dim), jnp.float32)
    # classifier: Linear(hidden_dim, n_class) -> stored (H, C)
    wc = s * jax.random.normal(ks[6], (hidden_dim, n_class), jnp.float32)
    bc = s * jax.random.normal(ks[7], (1, n_class), jnp.float32)
    return wih0, whh0, b0, wih1, whh1, b1, wc, bc


def rnn_reference(x, params):
    """Pure-JAX f32 reference with the module's semantics (correctness check)."""
    (wih0, whh0, b0, wih1, whh1, b1, wc, bc) = params
    B, T, D = x.shape
    H = whh0.shape[0]

    def cell(x_t, h, c, wih, whh, b):
        g = x_t @ wih + h @ whh + b
        i = jax.nn.sigmoid(g[:, 0 * H:1 * H])
        f = jax.nn.sigmoid(g[:, 1 * H:2 * H])
        gg = jnp.tanh(g[:, 2 * H:3 * H])
        o = jax.nn.sigmoid(g[:, 3 * H:4 * H])
        c = f * c + i * gg
        h = o * jnp.tanh(c)
        return h, c

    h1 = c1 = h2 = c2 = jnp.zeros((B, H), jnp.float32)
    for t in range(T):
        h1, c1 = cell(x[:, t, :], h1, c1, wih0, whh0, b0)
        h2, c2 = cell(h1, h2, c2, wih1, whh1, b1)
    return h2 @ wc + bc


if __name__ == "__main__":
    # Small shapes consistent with the module's forward: (B, T, in_dim).
    # HIDDEN=32 -> the 4H gate vector is exactly 128 lanes (one vreg wide).
    B, T, IN_DIM, HIDDEN, N_CLASS = 2, 8, 28, 32, 10

    key = jax.random.PRNGKey(0)
    kx, kp = jax.random.split(key)
    x = jax.random.normal(kx, (B, T, IN_DIM), jnp.float32)
    params = init_params(kp, IN_DIM, HIDDEN, N_CLASS)

    out = jax.block_until_ready(jax.jit(rnn_forward)(x, params))
    ref = rnn_reference(x, params)

    assert out.shape == (B, N_CLASS)
    # Tolerance loosened vs. the f32 reference because the kernel's recurrent
    # matmul inputs are bf16 (per perf review); layout/gate bugs would show up
    # as O(0.1..1) errors, far above this bound.
    assert jnp.allclose(out, ref, atol=2e-2, rtol=2e-2), (out, ref)
    print("KERNEL_OK")
</pallas_src>

<mosaic_0001>
module attributes {stable_mosaic.version = 11 : i64} {
  func.func @_lstm_classifier_kernel(%arg0: memref<64x32xf32, #tpu.memory_space<vmem>>, %arg1: memref<32x128xf32, #tpu.memory_space<vmem>>, %arg2: memref<32x128xbf16, #tpu.memory_space<vmem>>, %arg3: memref<1x128xf32, #tpu.memory_space<vmem>>, %arg4: memref<64x128xbf16, #tpu.memory_space<vmem>>, %arg5: memref<1x128xf32, #tpu.memory_space<vmem>>, %arg6: memref<32x128xf32, #tpu.memory_space<vmem>>, %arg7: memref<1x128xf32, #tpu.memory_space<vmem>>, %arg8: memref<8x128xf32, #tpu.memory_space<vmem>>, %arg9: memref<64x128xf32, #tpu.memory_space<vmem>>) attributes {dimension_semantics = [], scalar_prefetch = 0 : i64, scratch_operands = 1 : i64, tpu.core_type = #tpu.core_type<tc>} {
    %c0 = arith.constant 0 : index
    %c0_0 = arith.constant 0 : index
    %0 = vector.load %arg0[%c0, %c0_0] : memref<64x32xf32, #tpu.memory_space<vmem>>, vector<64x32xf32>
    %c0_1 = arith.constant 0 : index
    %c0_2 = arith.constant 0 : index
    %1 = vector.load %arg1[%c0_1, %c0_2] : memref<32x128xf32, #tpu.memory_space<vmem>>, vector<32x128xf32>
    %cst = arith.constant dense<0.000000e+00> : vector<64x128xf32>
    %2 = tpu.matmul %0, %1, %cst {dimension_numbers = #tpu.dot_dimension_numbers<[1], [0], [0], [1], [0, 0, 1, 1], [], []>} : vector<64x32xf32>, vector<32x128xf32>, vector<64x128xf32> -> vector<64x128xf32>
    %c0_3 = arith.constant 0 : index
    %c0_4 = arith.constant 0 : index
    %3 = vector.load %arg3[%c0_3, %c0_4] : memref<1x128xf32, #tpu.memory_space<vmem>>, vector<1x128xf32>
    %4 = vector.broadcast %3 : vector<1x128xf32> to vector<64x128xf32>
    %5 = arith.addf %2, %4 : vector<64x128xf32>
    %c0_5 = arith.constant 0 : index
    %c0_6 = arith.constant 0 : index
    %6 = vector.load %arg9[%c0_5, %c0_6] : memref<64x128xf32, #tpu.memory_space<vmem>>, vector<64x128xf32>
    tpu.vector_store %arg9[%c0_5, %c0_6], %5 {strides = array<i32>} : memref<64x128xf32, #tpu.memory_space<vmem>>, vector<64x128xf32>,
    %c0_7 = arith.constant 0 : index
    %c0_8 = arith.constant 0 : index
    %7 = vector.load %arg5[%c0_7, %c0_8] : memref<1x128xf32, #tpu.memory_space<vmem>>, vector<1x128xf32>
    %8 = vector.shape_cast %7 : vector<1x128xf32> to vector<1x128xf32>
    %9 = vector.broadcast %8 : vector<1x128xf32> to vector<8x128xf32>
    %10 = tpu.iota {dimensions = array<i32: 1>} : vector<8x128xi32>
    %c64_i32 = arith.constant 64 : i32
    %11 = vector.broadcast %c64_i32 : i32 to vector<8x128xi32>
    %12 = arith.cmpi sge, %10, %11 : vector<8x128xi32>
    %c96_i32 = arith.constant 96 : i32
    %13 = vector.broadcast %c96_i32 : i32 to vector<8x128xi32>
    %14 = arith.cmpi slt, %10, %13 : vector<8x128xi32>
    %15 = arith.andi %12, %14 : vector<8x128xi1>
    %cst_9 = arith.constant 0.000000e+00 : f32
    %16 = vector.broadcast %cst_9 : f32 to vector<8x32xf32>
    %c0_10 = arith.constant 0 : index
    %c0_11 = arith.constant 0 : index
    %17 = vector.load %arg9[%c0_10, %c0_11] : memref<64x128xf32, #tpu.memory_space<vmem>>, vector<8x128xf32>
    %cst_12 = arith.constant 5.000000e-01 : f32
    %18 = vector.broadcast %cst_12 : f32 to vector<8x128xf32>
    %19 = arith.mulf %18, %17 : vector<8x128xf32>
    %20 = arith.select %15, %17, %19 : vector<8x128xi1>, vector<8x128xf32>
    %21 = math.tanh %20 : vector<8x128xf32>
    %cst_13 = arith.constant 5.000000e-01 : f32
    %22 = vector.broadcast %cst_13 : f32 to vector<8x128xf32>
    %23 = arith.mulf %22, %21 : vector<8x128xf32>
    %cst_14 = arith.constant 5.000000e-01 : f32
    %24 = vector.broadcast %cst_14 : f32 to vector<8x128xf32>
    %25 = arith.addf %23, %24 : vector<8x128xf32>
    %26 = arith.select %15, %21, %25 : vector<8x128xi1>, vector<8x128xf32>
    %27 = vector.extract_strided_slice %26 {offsets = [0, 0], sizes = [8, 32], strides = [1, 1]} : vector<8x128xf32> to vector<8x32xf32>
    %28 = vector.extract_strided_slice %26 {offsets = [0, 32], sizes = [8, 32], strides = [1, 1]} : vector<8x128xf32> to vector<8x32xf32>
    %29 = vector.extract_strided_slice %26 {offsets = [0, 64], sizes = [8, 32], strides = [1, 1]} : vector<8x128xf32> to vector<8x32xf32>
    %30 = vector.extract_strided_slice %26 {offsets = [0, 96], sizes = [8, 32], strides = [1, 1]} : vector<8x128xf32> to vector<8x32xf32>
    %31 = arith.mulf %28, %16 : vector<8x32xf32>
    %32 = arith.mulf %27, %29 : vector<8x32xf32>
    %33 = arith.addf %31, %32 : vector<8x32xf32>
    %34 = math.tanh %33 : vector<8x32xf32>
    %35 = arith.mulf %30, %34 : vector<8x32xf32>
    %36 = tpu.concatenate %35, %16 in 1 : vector<8x32xf32>, vector<8x32xf32> -> vector<8x64xf32>
    %37 = arith.truncf %36 : vector<8x64xf32> to vector<8x64xbf16>
    %c0_15 = arith.constant 0 : index
    %c0_16 = arith.constant 0 : index
    %38 = vector.load %arg4[%c0_15, %c0_16] : memref<64x128xbf16, #tpu.memory_space<vmem>>, vector<64x128xbf16>
    %cst_17 = arith.constant dense<0.000000e+00> : vector<8x128xf32>
    %39 = tpu.matmul %37, %38, %cst_17 {dimension_numbers = #tpu.dot_dimension_numbers<[1], [0], [0], [1], [0, 0, 1, 1], [], []>} : vector<8x64xbf16>, vector<64x128xbf16>, vector<8x128xf32> -> vector<8x128xf32>
    %40 = arith.addf %39, %9 : vector<8x128xf32>
    %c8 = arith.constant 8 : index
    %c0_18 = arith.constant 0 : index
    %41 = vector.load %arg9[%c8, %c0_18] : memref<64x128xf32, #tpu.memory_space<vmem>>, vector<8x128xf32>
    %42 = arith.truncf %35 : vector<8x32xf32> to vector<8x32xbf16>
    %c0_19 = arith.constant 0 : index
    %c0_20 = arith.constant 0 : index
    %43 = vector.load %arg2[%c0_19, %c0_20] : memref<32x128xbf16, #tpu.memory_space<vmem>>, vector<32x128xbf16>
    %cst_21 = arith.constant dense<0.000000e+00> : vector<8x128xf32>
    %44 = tpu.matmul %42, %43, %cst_21 {dimension_numbers = #tpu.dot_dimension_numbers<[1], [0], [0], [1], [0, 0, 1, 1], [], []>} : vector<8x32xbf16>, vector<32x128xbf16>, vector<8x128xf32> -> vector<8x128xf32>
    %45 = arith.addf %41, %44 : vector<8x128xf32>
    %cst_22 = arith.constant 5.000000e-01 : f32
    %46 = vector.broadcast %cst_22 : f32 to vector<8x128xf32>
    %47 = arith.mulf %46, %40 : vector<8x128xf32>
    %48 = arith.select %15, %40, %47 : vector<8x128xi1>, vector<8x128xf32>
    %49 = math.tanh %48 : vector<8x128xf32>
    %cst_23 = arith.constant 5.000000e-01 : f32
    %50 = vector.broadcast %cst_23 : f32 to vector<8x128xf32>
    %51 = arith.mulf %50, %49 : vector<8x128xf32>
    %cst_24 = arith.constant 5.000000e-01 : f32
    %52 = vector.broadcast %cst_24 : f32 to vector<8x128xf32>
    %53 = arith.addf %51, %52 : vector<8x128xf32>
    %54 = arith.select %15, %49, %53 : vector<8x128xi1>, vector<8x128xf32>
    %55 = vector.extract_strided_slice %54 {offsets = [0, 0], sizes = [8, 32], strides = [1, 1]} : vector<8x128xf32> to vector<8x32xf32>
    %56 = vector.extract_strided_slice %54 {offsets = [0, 32], sizes = [8, 32], strides = [1, 1]} : vector<8x128xf32> to vector<8x32xf32>
    %57 = vector.extract_strided_slice %54 {offsets = [0, 64], sizes = [8, 32], strides = [1, 1]} : vector<8x128xf32> to vector<8x32xf32>
    %58 = vector.extract_strided_slice %54 {offsets = [0, 96], sizes = [8, 32], strides = [1, 1]} : vector<8x128xf32> to vector<8x32xf32>
    %59 = arith.mulf %56, %16 : vector<8x32xf32>
    %60 = arith.mulf %55, %57 : vector<8x32xf32>
    %61 = arith.addf %59, %60 : vector<8x32xf32>
    %62 = math.tanh %61 : vector<8x32xf32>
    %63 = arith.mulf %58, %62 : vector<8x32xf32>
    %cst_25 = arith.constant 5.000000e-01 : f32
    %64 = vector.broadcast %cst_25 : f32 to vector<8x128xf32>
    %65 = arith.mulf %64, %45 : vector<8x128xf32>
    %66 = arith.select %15, %45, %65 : vector<8x128xi1>, vector<8x128xf32>
    %67 = math.tanh %66 : vector<8x128xf32>
    %cst_26 = arith.constant 5.000000e-01 : f32
    %68 = vector.broadcast %cst_26 : f32 to vector<8x128xf32>
    %69 = arith.mulf %68, %67 : vector<8x128xf32>
    %cst_27 = arith.constant 5.000000e-01 : f32
    %70 = vector.broadcast %cst_27 : f32 to vector<8x128xf32>
    %71 = arith.addf %69, %70 : vector<8x128xf32>
    %72 = arith.select %15, %67, %71 : vector<8x128xi1>, vector<8x128xf32>
    %73 = vector.extract_strided_slice %72 {offsets = [0, 0], sizes = [8, 32], strides = [1, 1]} : vector<8x128xf32> to vector<8x32xf32>
    %74 = vector.extract_strided_slice %72 {offsets = [0, 32], sizes = [8, 32], strides = [1, 1]} : vector<8x128xf32> to vector<8x32xf32>
    %75 = vector.extract_strided_slice %72 {offsets = [0, 64], sizes = [8, 32], strides = [1, 1]} : vector<8x128xf32> to vector<8x32xf32>
    %76 = vector.extract_strided_slice %72 {offsets = [0, 96], sizes = [8, 32], strides = [1, 1]} : vector<8x128xf32> to vector<8x32xf32>
    %77 = arith.mulf %74, %33 : vector<8x32xf32>
    %78 = arith.mulf %73, %75 : vector<8x32xf32>
    %79 = arith.addf %77, %78 : vector<8x32xf32>
    %80 = math.tanh %79 : vector<8x32xf32>
    %81 = arith.mulf %76, %80 : vector<8x32xf32>
    %82 = tpu.concatenate %81, %63 in 1 : vector<8x32xf32>, vector<8x32xf32> -> vector<8x64xf32>
    %83 = arith.truncf %82 : vector<8x64xf32> to vector<8x64xbf16>
    %c0_28 = arith.constant 0 : index
    %c0_29 = arith.constant 0 : index
    %84 = vector.load %arg4[%c0_28, %c0_29] : memref<64x128xbf16, #tpu.memory_space<vmem>>, vector<64x128xbf16>
    %cst_30 = arith.constant dense<0.000000e+00> : vector<8x128xf32>
    %85 = tpu.matmul %83, %84, %cst_30 {dimension_numbers = #tpu.dot_dimension_numbers<[1], [0], [0], [1], [0, 0, 1, 1], [], []>} : vector<8x64xbf16>, vector<64x128xbf16>, vector<8x128xf32> -> vector<8x128xf32>
    %86 = arith.addf %85, %9 : vector<8x128xf32>
    %c16 = arith.constant 16 : index
    %c0_31 = arith.constant 0 : index
    %87 = vector.load %arg9[%c16, %c0_31] : memref<64x128xf32, #tpu.memory_space<vmem>>, vector<8x128xf32>
    %88 = arith.truncf %81 : vector<8x32xf32> to vector<8x32xbf16>
    %c0_32 = arith.constant 0 : index
    %c0_33 = arith.constant 0 : index
    %89 = vector.load %arg2[%c0_32, %c0_33] : memref<32x128xbf16, #tpu.memory_space<vmem>>, vector<32x128xbf16>
    %cst_34 = arith.constant dense<0.000000e+00> : vector<8x128xf32>
    %90 = tpu.matmul %88, %89, %cst_34 {dimension_numbers = #tpu.dot_dimension_numbers<[1], [0], [0], [1], [0, 0, 1, 1], [], []>} : vector<8x32xbf16>, vector<32x128xbf16>, vector<8x128xf32> -> vector<8x128xf32>
    %91 = arith.addf %87, %90 : vector<8x128xf32>
    %cst_35 = arith.constant 5.000000e-01 : f32
    %92 = vector.broadcast %cst_35 : f32 to vector<8x128xf32>
    %93 = arith.mulf %92, %86 : vector<8x128xf32>
    %94 = arith.select %15, %86, %93 : vector<8x128xi1>, vector<8x128xf32>
    %95 = math.tanh %94 : vector<8x128xf32>
    %cst_36 = arith.constant 5.000000e-01 : f32
    %96 = vector.broadcast %cst_36 : f32 to vector<8x128xf32>
    %97 = arith.mulf %96, %95 : vector<8x128xf32>
    %cst_37 = arith.constant 5.000000e-01 : f32
    %98 = vector.broadcast %cst_37 : f32 to vector<8x128xf32>
    %99 = arith.addf %97, %98 : vector<8x128xf32>
    %100 = arith.select %15, %95, %99 : vector<8x128xi1>, vector<8x128xf32>
    %101 = vector.extract_strided_slice %100 {offsets = [0, 0], sizes = [8, 32], strides = [1, 1]} : vector<8x128xf32> to vector<8x32xf32>
    %102 = vector.extract_strided_slice %100 {offsets = [0, 32], sizes = [8, 32], strides = [1, 1]} : vector<8x128xf32> to vector<8x32xf32>
    %103 = vector.extract_strided_slice %100 {offsets = [0, 64], sizes = [8, 32], strides = [1, 1]} : vector<8x128xf32> to vector<8x32xf32>
    %104 = vector.extract_strided_slice %100 {offsets = [0, 96], sizes = [8, 32], strides = [1, 1]} : vector<8x128xf32> to vector<8x32xf32>
    %105 = arith.mulf %102, %61 : vector<8x32xf32>
    %106 = arith.mulf %101, %103 : vector<8x32xf32>
    %107 = arith.addf %105, %106 : vector<8x32xf32>
    %108 = math.tanh %107 : vector<8x32xf32>
    %109 = arith.mulf %104, %108 : vector<8x32xf32>
    %cst_38 = arith.constant 5.000000e-01 : f32
    %110 = vector.broadcast %cst_38 : f32 to vector<8x128xf32>
    %111 = arith.mulf %110, %91 : vector<8x128xf32>
    %112 = arith.select %15, %91, %111 : vector<8x128xi1>, vector<8x128xf32>
    %113 = math.tanh %112 : vector<8x128xf32>
    %cst_39 = arith.constant 5.000000e-01 : f32
    %114 = vector.broadcast %cst_39 : f32 to vector<8x128xf32>
    %115 = arith.mulf %114, %113 : vector<8x128xf32>
    %cst_40 = arith.constant 5.000000e-01 : f32
    %116 = vector.broadcast %cst_40 : f32 to vector<8x128xf32>
    %117 = arith.addf %115, %116 : vector<8x128xf32>
    %118 = arith.select %15, %113, %117 : vector<8x128xi1>, vector<8x128xf32>
    %119 = vector.extract_strided_slice %118 {offsets = [0, 0], sizes = [8, 32], strides = [1, 1]} : vector<8x128xf32> to vector<8x32xf32>
    %120 = vector.extract_strided_slice %118 {offsets = [0, 32], sizes = [8, 32], strides = [1, 1]} : vector<8x128xf32> to vector<8x32xf32>
    %121 = vector.extract_strided_slice %118 {offsets = [0, 64], sizes = [8, 32], strides = [1, 1]} : vector<8x128xf32> to vector<8x32xf32>
    %122 = vector.extract_strided_slice %118 {offsets = [0, 96], sizes = [8, 32], strides = [1, 1]} : vector<8x128xf32> to vector<8x32xf32>
    %123 = arith.mulf %120, %79 : vector<8x32xf32>
    %124 = arith.mulf %119, %121 : vector<8x32xf32>
    %125 = arith.addf %123, %124 : vector<8x32xf32>
    %126 = math.tanh %125 : vector<8x32xf32>
    %127 = arith.mulf %122, %126 : vector<8x32xf32>
    %128 = tpu.concatenate %127, %109 in 1 : vector<8x32xf32>, vector<8x32xf32> -> vector<8x64xf32>
    %129 = arith.truncf %128 : vector<8x64xf32> to vector<8x64xbf16>
    %c0_41 = arith.constant 0 : index
    %c0_42 = arith.constant 0 : index
    %130 = vector.load %arg4[%c0_41, %c0_42] : memref<64x128xbf16, #tpu.memory_space<vmem>>, vector<64x128xbf16>
    %cst_43 = arith.constant dense<0.000000e+00> : vector<8x128xf32>
    %131 = tpu.matmul %129, %130, %cst_43 {dimension_numbers = #tpu.dot_dimension_numbers<[1], [0], [0], [1], [0, 0, 1, 1], [], []>} : vector<8x64xbf16>, vector<64x128xbf16>, vector<8x128xf32> -> vector<8x128xf32>
    %132 = arith.addf %131, %9 : vector<8x128xf32>
    %c24 = arith.constant 24 : index
    %c0_44 = arith.constant 0 : index
    %133 = vector.load %arg9[%c24, %c0_44] : memref<64x128xf32, #tpu.memory_space<vmem>>, vector<8x128xf32>
    %134 = arith.truncf %127 : vector<8x32xf32> to vector<8x32xbf16>
    %c0_45 = arith.constant 0 : index
    %c0_46 = arith.constant 0 : index
    %135 = vector.load %arg2[%c0_45, %c0_46] : memref<32x128xbf16, #tpu.memory_space<vmem>>, vector<32x128xbf16>
    %cst_47 = arith.constant dense<0.000000e+00> : vector<8x128xf32>
    %136 = tpu.matmul %134, %135, %cst_47 {dimension_numbers = #tpu.dot_dimension_numbers<[1], [0], [0], [1], [0, 0, 1, 1], [], []>} : vector<8x32xbf16>, vector<32x128xbf16>, vector<8x128xf32> -> vector<8x128xf32>
    %137 = arith.addf %133, %136 : vector<8x128xf32>
    %cst_48 = arith.constant 5.000000e-01 : f32
    %138 = vector.broadcast %cst_48 : f32 to vector<8x128xf32>
    %139 = arith.mulf %138, %132 : vector<8x128xf32>
    %140 = arith.select %15, %132, %139 : vector<8x128xi1>, vector<8x128xf32>
    %141 = math.tanh %140 : vector<8x128xf32>
    %cst_49 = arith.constant 5.000000e-01 : f32
    %142 = vector.broadcast %cst_49 : f32 to vector<8x128xf32>
    %143 = arith.mulf %142, %141 : vector<8x128xf32>
    %cst_50 = arith.constant 5.000000e-01 : f32
    %144 = vector.broadcast %cst_50 : f32 to vector<8x128xf32>
    %145 = arith.addf %143, %144 : vector<8x128xf32>
    %146 = arith.select %15, %141, %145 : vector<8x128xi1>, vector<8x128xf32>
    %147 = vector.extract_strided_slice %146 {offsets = [0, 0], sizes = [8, 32], strides = [1, 1]} : vector<8x128xf32> to vector<8x32xf32>
    %148 = vector.extract_strided_slice %146 {offsets = [0, 32], sizes = [8, 32], strides = [1, 1]} : vector<8x128xf32> to vector<8x32xf32>
    %149 = vector.extract_strided_slice %146 {offsets = [0, 64], sizes = [8, 32], strides = [1, 1]} : vector<8x128xf32> to vector<8x32xf32>
    %150 = vector.extract_strided_slice %146 {offsets = [0, 96], sizes = [8, 32], strides = [1, 1]} : vector<8x128xf32> to vector<8x32xf32>
    %151 = arith.mulf %148, %107 : vector<8x32xf32>
    %152 = arith.mulf %147, %149 : vector<8x32xf32>
    %153 = arith.addf %151, %152 : vector<8x32xf32>
    %154 = math.tanh %153 : vector<8x32xf32>
    %155 = arith.mulf %150, %154 : vector<8x32xf32>
    %cst_51 = arith.constant 5.000000e-01 : f32
    %156 = vector.broadcast %cst_51 : f32 to vector<8x128xf32>
    %157 = arith.mulf %156, %137 : vector<8x128xf32>
    %158 = arith.select %15, %137, %157 : vector<8x128xi1>, vector<8x128xf32>
    %159 = math.tanh %158 : vector<8x128xf32>
    %cst_52 = arith.constant 5.000000e-01 : f32
    %160 = vector.broadcast %cst_52 : f32 to vector<8x128xf32>
    %161 = arith.mulf %160, %159 : vector<8x128xf32>
    %cst_53 = arith.constant 5.000000e-01 : f32
    %162 = vector.broadcast %cst_53 : f32 to vector<8x128xf32>
    %163 = arith.addf %161, %162 : vector<8x128xf32>
    %164 = arith.select %15, %159, %163 : vector<8x128xi1>, vector<8x128xf32>
    %165 = vector.extract_strided_slice %164 {offsets = [0, 0], sizes = [8, 32], strides = [1, 1]} : vector<8x128xf32> to vector<8x32xf32>
    %166 = vector.extract_strided_slice %164 {offsets = [0, 32], sizes = [8, 32], strides = [1, 1]} : vector<8x128xf32> to vector<8x32xf32>
    %167 = vector.extract_strided_slice %164 {offsets = [0, 64], sizes = [8, 32], strides = [1, 1]} : vector<8x128xf32> to vector<8x32xf32>
    %168 = vector.extract_strided_slice %164 {offsets = [0, 96], sizes = [8, 32], strides = [1, 1]} : vector<8x128xf32> to vector<8x32xf32>
    %169 = arith.mulf %166, %125 : vector<8x32xf32>
    %170 = arith.mulf %165, %167 : vector<8x32xf32>
    %171 = arith.addf %169, %170 : vector<8x32xf32>
    %172 = math.tanh %171 : vector<8x32xf32>
    %173 = arith.mulf %168, %172 : vector<8x32xf32>
    %174 = tpu.concatenate %173, %155 in 1 : vector<8x32xf32>, vector<8x32xf32> -> vector<8x64xf32>
    %175 = arith.truncf %174 : vector<8x64xf32> to vector<8x64xbf16>
    %c0_54 = arith.constant 0 : index
    %c0_55 = arith.constant 0 : index
    %176 = vector.load %arg4[%c0_54, %c0_55] : memref<64x128xbf16, #tpu.memory_space<vmem>>, vector<64x128xbf16>
    %cst_56 = arith.constant dense<0.000000e+00> : vector<8x128xf32>
    %177 = tpu.matmul %175, %176, %cst_56 {dimension_numbers = #tpu.dot_dimension_numbers<[1], [0], [0], [1], [0, 0, 1, 1], [], []>} : vector<8x64xbf16>, vector<64x128xbf16>, vector<8x128xf32> -> vector<8x128xf32>
    %178 = arith.addf %177, %9 : vector<8x128xf32>
    %c32 = arith.constant 32 : index
    %c0_57 = arith.constant 0 : index
    %179 = vector.load %arg9[%c32, %c0_57] : memref<64x128xf32, #tpu.memory_space<vmem>>, vector<8x128xf32>
    %180 = arith.truncf %173 : vector<8x32xf32> to vector<8x32xbf16>
    %c0_58 = arith.constant 0 : index
    %c0_59 = arith.constant 0 : index
    %181 = vector.load %arg2[%c0_58, %c0_59] : memref<32x128xbf16, #tpu.memory_space<vmem>>, vector<32x128xbf16>
    %cst_60 = arith.constant dense<0.000000e+00> : vector<8x128xf32>
    %182 = tpu.matmul %180, %181, %cst_60 {dimension_numbers = #tpu.dot_dimension_numbers<[1], [0], [0], [1], [0, 0, 1, 1], [], []>} : vector<8x32xbf16>, vector<32x128xbf16>, vector<8x128xf32> -> vector<8x128xf32>
    %183 = arith.addf %179, %182 : vector<8x128xf32>
    %cst_61 = arith.constant 5.000000e-01 : f32
    %184 = vector.broadcast %cst_61 : f32 to vector<8x128xf32>
    %185 = arith.mulf %184, %178 : vector<8x128xf32>
    %186 = arith.select %15, %178, %185 : vector<8x128xi1>, vector<8x128xf32>
    %187 = math.tanh %186 : vector<8x128xf32>
    %cst_62 = arith.constant 5.000000e-01 : f32
    %188 = vector.broadcast %cst_62 : f32 to vector<8x128xf32>
    %189 = arith.mulf %188, %187 : vector<8x128xf32>
    %cst_63 = arith.constant 5.000000e-01 : f32
    %190 = vector.broadcast %cst_63 : f32 to vector<8x128xf32>
    %191 = arith.addf %189, %190 : vector<8x128xf32>
    %192 = arith.select %15, %187, %191 : vector<8x128xi1>, vector<8x128xf32>
    %193 = vector.extract_strided_slice %192 {offsets = [0, 0], sizes = [8, 32], strides = [1, 1]} : vector<8x128xf32> to vector<8x32xf32>
    %194 = vector.extract_strided_slice %192 {offsets = [0, 32], sizes = [8, 32], strides = [1, 1]} : vector<8x128xf32> to vector<8x32xf32>
    %195 = vector.extract_strided_slice %192 {offsets = [0, 64], sizes = [8, 32], strides = [1, 1]} : vector<8x128xf32> to vector<8x32xf32>
    %196 = vector.extract_strided_slice %192 {offsets = [0, 96], sizes = [8, 32], strides = [1, 1]} : vector<8x128xf32> to vector<8x32xf32>
    %197 = arith.mulf %194, %153 : vector<8x32xf32>
    %198 = arith.mulf %193, %195 : vector<8x32xf32>
    %199 = arith.addf %197, %198 : vector<8x32xf32>
    %200 = math.tanh %199 : vector<8x32xf32>
    %201 = arith.mulf %196, %200 : vector<8x32xf32>
    %cst_64 = arith.constant 5.000000e-01 : f32
    %202 = vector.broadcast %cst_64 : f32 to vector<8x128xf32>
    %203 = arith.mulf %202, %183 : vector<8x128xf32>
    %204 = arith.select %15, %183, %203 : vector<8x128xi1>, vector<8x128xf32>
    %205 = math.tanh %204 : vector<8x128xf32>
    %cst_65 = arith.constant 5.000000e-01 : f32
    %206 = vector.broadcast %cst_65 : f32 to vector<8x128xf32>
    %207 = arith.mulf %206, %205 : vector<8x128xf32>
    %cst_66 = arith.constant 5.000000e-01 : f32
    %208 = vector.broadcast %cst_66 : f32 to vector<8x128xf32>
    %209 = arith.addf %207, %208 : vector<8x128xf32>
    %210 = arith.select %15, %205, %209 : vector<8x128xi1>, vector<8x128xf32>
    %211 = vector.extract_strided_slice %210 {offsets = [0, 0], sizes = [8, 32], strides = [1, 1]} : vector<8x128xf32> to vector<8x32xf32>
    %212 = vector.extract_strided_slice %210 {offsets = [0, 32], sizes = [8, 32], strides = [1, 1]} : vector<8x128xf32> to vector<8x32xf32>
    %213 = vector.extract_strided_slice %210 {offsets = [0, 64], sizes = [8, 32], strides = [1, 1]} : vector<8x128xf32> to vector<8x32xf32>
    %214 = vector.extract_strided_slice %210 {offsets = [0, 96], sizes = [8, 32], strides = [1, 1]} : vector<8x128xf32> to vector<8x32xf32>
    %215 = arith.mulf %212, %171 : vector<8x32xf32>
    %216 = arith.mulf %211, %213 : vector<8x32xf32>
    %217 = arith.addf %215, %216 : vector<8x32xf32>
    %218 = math.tanh %217 : vector<8x32xf32>
    %219 = arith.mulf %214, %218 : vector<8x32xf32>
    %220 = tpu.concatenate %219, %201 in 1 : vector<8x32xf32>, vector<8x32xf32> -> vector<8x64xf32>
    %221 = arith.truncf %220 : vector<8x64xf32> to vector<8x64xbf16>
    %c0_67 = arith.constant 0 : index
    %c0_68 = arith.constant 0 : index
    %222 = vector.load %arg4[%c0_67, %c0_68] : memref<64x128xbf16, #tpu.memory_space<vmem>>, vector<64x128xbf16>
    %cst_69 = arith.constant dense<0.000000e+00> : vector<8x128xf32>
    %223 = tpu.matmul %221, %222, %cst_69 {dimension_numbers = #tpu.dot_dimension_numbers<[1], [0], [0], [1], [0, 0, 1, 1], [], []>} : vector<8x64xbf16>, vector<64x128xbf16>, vector<8x128xf32> -> vector<8x128xf32>
    %224 = arith.addf %223, %9 : vector<8x128xf32>
    %c40 = arith.constant 40 : index
    %c0_70 = arith.constant 0 : index
    %225 = vector.load %arg9[%c40, %c0_70] : memref<64x128xf32, #tpu.memory_space<vmem>>, vector<8x128xf32>
    %226 = arith.truncf %219 : vector<8x32xf32> to vector<8x32xbf16>
    %c0_71 = arith.constant 0 : index
    %c0_72 = arith.constant 0 : index
    %227 = vector.load %arg2[%c0_71, %c0_72] : memref<32x128xbf16, #tpu.memory_space<vmem>>, vector<32x128xbf16>
    %cst_73 = arith.constant dense<0.000000e+00> : vector<8x128xf32>
    %228 = tpu.matmul %226, %227, %cst_73 {dimension_numbers = #tpu.dot_dimension_numbers<[1], [0], [0], [1], [0, 0, 1, 1], [], []>} : vector<8x32xbf16>, vector<32x128xbf16>, vector<8x128xf32> -> vector<8x128xf32>
    %229 = arith.addf %225, %228 : vector<8x128xf32>
    %cst_74 = arith.constant 5.000000e-01 : f32
    %230 = vector.broadcast %cst_74 : f32 to vector<8x128xf32>
    %231 = arith.mulf %230, %224 : vector<8x128xf32>
    %232 = arith.select %15, %224, %231 : vector<8x128xi1>, vector<8x128xf32>
    %233 = math.tanh %232 : vector<8x128xf32>
    %cst_75 = arith.constant 5.000000e-01 : f32
    %234 = vector.broadcast %cst_75 : f32 to vector<8x128xf32>
    %235 = arith.mulf %234, %233 : vector<8x128xf32>
    %cst_76 = arith.constant 5.000000e-01 : f32
    %236 = vector.broadcast %cst_76 : f32 to vector<8x128xf32>
    %237 = arith.addf %235, %236 : vector<8x128xf32>
    %238 = arith.select %15, %233, %237 : vector<8x128xi1>, vector<8x128xf32>
    %239 = vector.extract_strided_slice %238 {offsets = [0, 0], sizes = [8, 32], strides = [1, 1]} : vector<8x128xf32> to vector<8x32xf32>
    %240 = vector.extract_strided_slice %238 {offsets = [0, 32], sizes = [8, 32], strides = [1, 1]} : vector<8x128xf32> to vector<8x32xf32>
    %241 = vector.extract_strided_slice %238 {offsets = [0, 64], sizes = [8, 32], strides = [1, 1]} : vector<8x128xf32> to vector<8x32xf32>
    %242 = vector.extract_strided_slice %238 {offsets = [0, 96], sizes = [8, 32], strides = [1, 1]} : vector<8x128xf32> to vector<8x32xf32>
    %243 = arith.mulf %240, %199 : vector<8x32xf32>
    %244 = arith.mulf %239, %241 : vector<8x32xf32>
    %245 = arith.addf %243, %244 : vector<8x32xf32>
    %246 = math.tanh %245 : vector<8x32xf32>
    %247 = arith.mulf %242, %246 : vector<8x32xf32>
    %cst_77 = arith.constant 5.000000e-01 : f32
    %248 = vector.broadcast %cst_77 : f32 to vector<8x128xf32>
    %249 = arith.mulf %248, %229 : vector<8x128xf32>
    %250 = arith.select %15, %229, %249 : vector<8x128xi1>, vector<8x128xf32>
    %251 = math.tanh %250 : vector<8x128xf32>
    %cst_78 = arith.constant 5.000000e-01 : f32
    %252 = vector.broadcast %cst_78 : f32 to vector<8x128xf32>
    %253 = arith.mulf %252, %251 : vector<8x128xf32>
    %cst_79 = arith.constant 5.000000e-01 : f32
    %254 = vector.broadcast %cst_79 : f32 to vector<8x128xf32>
    %255 = arith.addf %253, %254 : vector<8x128xf32>
    %256 = arith.select %15, %251, %255 : vector<8x128xi1>, vector<8x128xf32>
    %257 = vector.extract_strided_slice %256 {offsets = [0, 0], sizes = [8, 32], strides = [1, 1]} : vector<8x128xf32> to vector<8x32xf32>
    %258 = vector.extract_strided_slice %256 {offsets = [0, 32], sizes = [8, 32], strides = [1, 1]} : vector<8x128xf32> to vector<8x32xf32>
    %259 = vector.extract_strided_slice %256 {offsets = [0, 64], sizes = [8, 32], strides = [1, 1]} : vector<8x128xf32> to vector<8x32xf32>
    %260 = vector.extract_strided_slice %256 {offsets = [0, 96], sizes = [8, 32], strides = [1, 1]} : vector<8x128xf32> to vector<8x32xf32>
    %261 = arith.mulf %258, %217 : vector<8x32xf32>
    %262 = arith.mulf %257, %259 : vector<8x32xf32>
    %263 = arith.addf %261, %262 : vector<8x32xf32>
    %264 = math.tanh %263 : vector<8x32xf32>
    %265 = arith.mulf %260, %264 : vector<8x32xf32>
    %266 = tpu.concatenate %265, %247 in 1 : vector<8x32xf32>, vector<8x32xf32> -> vector<8x64xf32>
    %267 = arith.truncf %266 : vector<8x64xf32> to vector<8x64xbf16>
    %c0_80 = arith.constant 0 : index
    %c0_81 = arith.constant 0 : index
    %268 = vector.load %arg4[%c0_80, %c0_81] : memref<64x128xbf16, #tpu.memory_space<vmem>>, vector<64x128xbf16>
    %cst_82 = arith.constant dense<0.000000e+00> : vector<8x128xf32>
    %269 = tpu.matmul %267, %268, %cst_82 {dimension_numbers = #tpu.dot_dimension_numbers<[1], [0], [0], [1], [0, 0, 1, 1], [], []>} : vector<8x64xbf16>, vector<64x128xbf16>, vector<8x128xf32> -> vector<8x128xf32>
    %270 = arith.addf %269, %9 : vector<8x128xf32>
    %c48 = arith.constant 48 : index
    %c0_83 = arith.constant 0 : index
    %271 = vector.load %arg9[%c48, %c0_83] : memref<64x128xf32, #tpu.memory_space<vmem>>, vector<8x128xf32>
    %272 = arith.truncf %265 : vector<8x32xf32> to vector<8x32xbf16>
    %c0_84 = arith.constant 0 : index
    %c0_85 = arith.constant 0 : index
    %273 = vector.load %arg2[%c0_84, %c0_85] : memref<32x128xbf16, #tpu.memory_space<vmem>>, vector<32x128xbf16>
    %cst_86 = arith.constant dense<0.000000e+00> : vector<8x128xf32>
    %274 = tpu.matmul %272, %273, %cst_86 {dimension_numbers = #tpu.dot_dimension_numbers<[1], [0], [0], [1], [0, 0, 1, 1], [], []>} : vector<8x32xbf16>, vector<32x128xbf16>, vector<8x128xf32> -> vector<8x128xf32>
    %275 = arith.addf %271, %274 : vector<8x128xf32>
    %cst_87 = arith.constant 5.000000e-01 : f32
    %276 = vector.broadcast %cst_87 : f32 to vector<8x128xf32>
    %277 = arith.mulf %276, %270 : vector<8x128xf32>
    %278 = arith.select %15, %270, %277 : vector<8x128xi1>, vector<8x128xf32>
    %279 = math.tanh %278 : vector<8x128xf32>
    %cst_88 = arith.constant 5.000000e-01 : f32
    %280 = vector.broadcast %cst_88 : f32 to vector<8x128xf32>
    %281 = arith.mulf %280, %279 : vector<8x128xf32>
    %cst_89 = arith.constant 5.000000e-01 : f32
    %282 = vector.broadcast %cst_89 : f32 to vector<8x128xf32>
    %283 = arith.addf %281, %282 : vector<8x128xf32>
    %284 = arith.select %15, %279, %283 : vector<8x128xi1>, vector<8x128xf32>
    %285 = vector.extract_strided_slice %284 {offsets = [0, 0], sizes = [8, 32], strides = [1, 1]} : vector<8x128xf32> to vector<8x32xf32>
    %286 = vector.extract_strided_slice %284 {offsets = [0, 32], sizes = [8, 32], strides = [1, 1]} : vector<8x128xf32> to vector<8x32xf32>
    %287 = vector.extract_strided_slice %284 {offsets = [0, 64], sizes = [8, 32], strides = [1, 1]} : vector<8x128xf32> to vector<8x32xf32>
    %288 = vector.extract_strided_slice %284 {offsets = [0, 96], sizes = [8, 32], strides = [1, 1]} : vector<8x128xf32> to vector<8x32xf32>
    %289 = arith.mulf %286, %245 : vector<8x32xf32>
    %290 = arith.mulf %285, %287 : vector<8x32xf32>
    %291 = arith.addf %289, %290 : vector<8x32xf32>
    %292 = math.tanh %291 : vector<8x32xf32>
    %293 = arith.mulf %288, %292 : vector<8x32xf32>
    %cst_90 = arith.constant 5.000000e-01 : f32
    %294 = vector.broadcast %cst_90 : f32 to vector<8x128xf32>
    %295 = arith.mulf %294, %275 : vector<8x128xf32>
    %296 = arith.select %15, %275, %295 : vector<8x128xi1>, vector<8x128xf32>
    %297 = math.tanh %296 : vector<8x128xf32>
    %cst_91 = arith.constant 5.000000e-01 : f32
    %298 = vector.broadcast %cst_91 : f32 to vector<8x128xf32>
    %299 = arith.mulf %298, %297 : vector<8x128xf32>
    %cst_92 = arith.constant 5.000000e-01 : f32
    %300 = vector.broadcast %cst_92 : f32 to vector<8x128xf32>
    %301 = arith.addf %299, %300 : vector<8x128xf32>
    %302 = arith.select %15, %297, %301 : vector<8x128xi1>, vector<8x128xf32>
    %303 = vector.extract_strided_slice %302 {offsets = [0, 0], sizes = [8, 32], strides = [1, 1]} : vector<8x128xf32> to vector<8x32xf32>
    %304 = vector.extract_strided_slice %302 {offsets = [0, 32], sizes = [8, 32], strides = [1, 1]} : vector<8x128xf32> to vector<8x32xf32>
    %305 = vector.extract_strided_slice %302 {offsets = [0, 64], sizes = [8, 32], strides = [1, 1]} : vector<8x128xf32> to vector<8x32xf32>
    %306 = vector.extract_strided_slice %302 {offsets = [0, 96], sizes = [8, 32], strides = [1, 1]} : vector<8x128xf32> to vector<8x32xf32>
    %307 = arith.mulf %304, %263 : vector<8x32xf32>
    %308 = arith.mulf %303, %305 : vector<8x32xf32>
    %309 = arith.addf %307, %308 : vector<8x32xf32>
    %310 = math.tanh %309 : vector<8x32xf32>
    %311 = arith.mulf %306, %310 : vector<8x32xf32>
    %312 = tpu.concatenate %311, %293 in 1 : vector<8x32xf32>, vector<8x32xf32> -> vector<8x64xf32>
    %313 = arith.truncf %312 : vector<8x64xf32> to vector<8x64xbf16>
    %c0_93 = arith.constant 0 : index
    %c0_94 = arith.constant 0 : index
    %314 = vector.load %arg4[%c0_93, %c0_94] : memref<64x128xbf16, #tpu.memory_space<vmem>>, vector<64x128xbf16>
    %cst_95 = arith.constant dense<0.000000e+00> : vector<8x128xf32>
    %315 = tpu.matmul %313, %314, %cst_95 {dimension_numbers = #tpu.dot_dimension_numbers<[1], [0], [0], [1], [0, 0, 1, 1], [], []>} : vector<8x64xbf16>, vector<64x128xbf16>, vector<8x128xf32> -> vector<8x128xf32>
    %316 = arith.addf %315, %9 : vector<8x128xf32>
    %c56 = arith.constant 56 : index
    %c0_96 = arith.constant 0 : index
    %317 = vector.load %arg9[%c56, %c0_96] : memref<64x128xf32, #tpu.memory_space<vmem>>, vector<8x128xf32>
    %318 = arith.truncf %311 : vector<8x32xf32> to vector<8x32xbf16>
    %c0_97 = arith.constant 0 : index
    %c0_98 = arith.constant 0 : index
    %319 = vector.load %arg2[%c0_97, %c0_98] : memref<32x128xbf16, #tpu.memory_space<vmem>>, vector<32x128xbf16>
    %cst_99 = arith.constant dense<0.000000e+00> : vector<8x128xf32>
    %320 = tpu.matmul %318, %319, %cst_99 {dimension_numbers = #tpu.dot_dimension_numbers<[1], [0], [0], [1], [0, 0, 1, 1], [], []>} : vector<8x32xbf16>, vector<32x128xbf16>, vector<8x128xf32> -> vector<8x128xf32>
    %321 = arith.addf %317, %320 : vector<8x128xf32>
    %cst_100 = arith.constant 5.000000e-01 : f32
    %322 = vector.broadcast %cst_100 : f32 to vector<8x128xf32>
    %323 = arith.mulf %322, %316 : vector<8x128xf32>
    %324 = arith.select %15, %316, %323 : vector<8x128xi1>, vector<8x128xf32>
    %325 = math.tanh %324 : vector<8x128xf32>
    %cst_101 = arith.constant 5.000000e-01 : f32
    %326 = vector.broadcast %cst_101 : f32 to vector<8x128xf32>
    %327 = arith.mulf %326, %325 : vector<8x128xf32>
    %cst_102 = arith.constant 5.000000e-01 : f32
    %328 = vector.broadcast %cst_102 : f32 to vector<8x128xf32>
    %329 = arith.addf %327, %328 : vector<8x128xf32>
    %330 = arith.select %15, %325, %329 : vector<8x128xi1>, vector<8x128xf32>
    %331 = vector.extract_strided_slice %330 {offsets = [0, 0], sizes = [8, 32], strides = [1, 1]} : vector<8x128xf32> to vector<8x32xf32>
    %332 = vector.extract_strided_slice %330 {offsets = [0, 32], sizes = [8, 32], strides = [1, 1]} : vector<8x128xf32> to vector<8x32xf32>
    %333 = vector.extract_strided_slice %330 {offsets = [0, 64], sizes = [8, 32], strides = [1, 1]} : vector<8x128xf32> to vector<8x32xf32>
    %334 = vector.extract_strided_slice %330 {offsets = [0, 96], sizes = [8, 32], strides = [1, 1]} : vector<8x128xf32> to vector<8x32xf32>
    %335 = arith.mulf %332, %291 : vector<8x32xf32>
    %336 = arith.mulf %331, %333 : vector<8x32xf32>
    %337 = arith.addf %335, %336 : vector<8x32xf32>
    %338 = math.tanh %337 : vector<8x32xf32>
    %339 = arith.mulf %334, %338 : vector<8x32xf32>
    %cst_103 = arith.constant 5.000000e-01 : f32
    %340 = vector.broadcast %cst_103 : f32 to vector<8x128xf32>
    %341 = arith.mulf %340, %321 : vector<8x128xf32>
    %342 = arith.select %15, %321, %341 : vector<8x128xi1>, vector<8x128xf32>
    %343 = math.tanh %342 : vector<8x128xf32>
    %cst_104 = arith.constant 5.000000e-01 : f32
    %344 = vector.broadcast %cst_104 : f32 to vector<8x128xf32>
    %345 = arith.mulf %344, %343 : vector<8x128xf32>
    %cst_105 = arith.constant 5.000000e-01 : f32
    %346 = vector.broadcast %cst_105 : f32 to vector<8x128xf32>
    %347 = arith.addf %345, %346 : vector<8x128xf32>
    %348 = arith.select %15, %343, %347 : vector<8x128xi1>, vector<8x128xf32>
    %349 = vector.extract_strided_slice %348 {offsets = [0, 0], sizes = [8, 32], strides = [1, 1]} : vector<8x128xf32> to vector<8x32xf32>
    %350 = vector.extract_strided_slice %348 {offsets = [0, 32], sizes = [8, 32], strides = [1, 1]} : vector<8x128xf32> to vector<8x32xf32>
    %351 = vector.extract_strided_slice %348 {offsets = [0, 64], sizes = [8, 32], strides = [1, 1]} : vector<8x128xf32> to vector<8x32xf32>
    %352 = vector.extract_strided_slice %348 {offsets = [0, 96], sizes = [8, 32], strides = [1, 1]} : vector<8x128xf32> to vector<8x32xf32>
    %353 = arith.mulf %350, %309 : vector<8x32xf32>
    %354 = arith.mulf %349, %351 : vector<8x32xf32>
    %355 = arith.addf %353, %354 : vector<8x32xf32>
    %356 = math.tanh %355 : vector<8x32xf32>
    %357 = arith.mulf %352, %356 : vector<8x32xf32>
    %358 = tpu.concatenate %357, %339 in 1 : vector<8x32xf32>, vector<8x32xf32> -> vector<8x64xf32>
    %359 = arith.truncf %358 : vector<8x64xf32> to vector<8x64xbf16>
    %c0_106 = arith.constant 0 : index
    %c0_107 = arith.constant 0 : index
    %360 = vector.load %arg4[%c0_106, %c0_107] : memref<64x128xbf16, #tpu.memory_space<vmem>>, vector<64x128xbf16>
    %cst_108 = arith.constant dense<0.000000e+00> : vector<8x128xf32>
    %361 = tpu.matmul %359, %360, %cst_108 {dimension_numbers = #tpu.dot_dimension_numbers<[1], [0], [0], [1], [0, 0, 1, 1], [], []>} : vector<8x64xbf16>, vector<64x128xbf16>, vector<8x128xf32> -> vector<8x128xf32>
    %362 = arith.addf %361, %9 : vector<8x128xf32>
    %cst_109 = arith.constant 5.000000e-01 : f32
    %363 = vector.broadcast %cst_109 : f32 to vector<8x128xf32>
    %364 = arith.mulf %363, %362 : vector<8x128xf32>
    %365 = arith.select %15, %362, %364 : vector<8x128xi1>, vector<8x128xf32>
    %366 = math.tanh %365 : vector<8x128xf32>
    %cst_110 = arith.constant 5.000000e-01 : f32
    %367 = vector.broadcast %cst_110 : f32 to vector<8x128xf32>
    %368 = arith.mulf %367, %366 : vector<8x128xf32>
    %cst_111 = arith.constant 5.000000e-01 : f32
    %369 = vector.broadcast %cst_111 : f32 to vector<8x128xf32>
    %370 = arith.addf %368, %369 : vector<8x128xf32>
    %371 = arith.select %15, %366, %370 : vector<8x128xi1>, vector<8x128xf32>
    %372 = vector.extract_strided_slice %371 {offsets = [0, 0], sizes = [8, 32], strides = [1, 1]} : vector<8x128xf32> to vector<8x32xf32>
    %373 = vector.extract_strided_slice %371 {offsets = [0, 32], sizes = [8, 32], strides = [1, 1]} : vector<8x128xf32> to vector<8x32xf32>
    %374 = vector.extract_strided_slice %371 {offsets = [0, 64], sizes = [8, 32], strides = [1, 1]} : vector<8x128xf32> to vector<8x32xf32>
    %375 = vector.extract_strided_slice %371 {offsets = [0, 96], sizes = [8, 32], strides = [1, 1]} : vector<8x128xf32> to vector<8x32xf32>
    %376 = arith.mulf %373, %337 : vector<8x32xf32>
    %377 = arith.mulf %372, %374 : vector<8x32xf32>
    %378 = arith.addf %376, %377 : vector<8x32xf32>
    %379 = math.tanh %378 : vector<8x32xf32>
    %380 = arith.mulf %375, %379 : vector<8x32xf32>
    %c0_112 = arith.constant 0 : index
    %c0_113 = arith.constant 0 : index
    %381 = vector.load %arg6[%c0_112, %c0_113] : memref<32x128xf32, #tpu.memory_space<vmem>>, vector<32x128xf32>
    %cst_114 = arith.constant dense<0.000000e+00> : vector<8x128xf32>
    %382 = tpu.matmul %380, %381, %cst_114 {dimension_numbers = #tpu.dot_dimension_numbers<[1], [0], [0], [1], [0, 0, 1, 1], [], []>} : vector<8x32xf32>, vector<32x128xf32>, vector<8x128xf32> -> vector<8x128xf32>
    %c0_115 = arith.constant 0 : index
    %c0_116 = arith.constant 0 : index
    %383 = vector.load %arg7[%c0_115, %c0_116] : memref<1x128xf32, #tpu.memory_space<vmem>>, vector<1x128xf32>
    %384 = vector.broadcast %383 : vector<1x128xf32> to vector<8x128xf32>
    %385 = arith.addf %382, %384 : vector<8x128xf32>
    %c0_117 = arith.constant 0 : index
    %c0_118 = arith.constant 0 : index
    %386 = vector.load %arg8[%c0_117, %c0_118] : memref<8x128xf32, #tpu.memory_space<vmem>>, vector<8x128xf32>
    tpu.vector_store %arg8[%c0_117, %c0_118], %385 {strides = array<i32>} : memref<8x128xf32, #tpu.memory_space<vmem>>, vector<8x128xf32>,
    return
  }
}

</mosaic_0001>

<bundles_post_ra>
// kernel: rnn_forward.1
= control target key start
LH: loop header
LB: loop body
LE: loop exit
PB: predicated region body
PF: predicated region fallthrough
CT: control target
= control target key end

     0   :  { %vm49_vm0 = vcmask 261120   ;;  %v194_v8 = vlaneseq  ;;  %s1855_s18 = smov 64   ;;  %s1856_s19 = smov 32   ;;  %v1857_v29 = vmov 0.0   ;;  %vm1858_vm4 = vmmov 0   ;;  %s2385_s1 = inlined_call_operand.vmem [shape: f32[32,128], index: 1, kind: input, shape index: {}]   ;;  %s2386_s0 = inlined_call_operand.vmem [shape: f32[64,32], index: 0, kind: input, shape index: {}]   ;;  %s2387_s3 = inlined_call_operand.vmem [shape: f32[1,128], index: 3, kind: input, shape index: {}]   ;;  %s2388_s2 = inlined_call_operand.vmem [shape: bf16[32,128], index: 2, kind: input, shape index: {}]   ;;  %s2389_s4 = inlined_call_operand.vmem [shape: bf16[64,128], index: 4, kind: input, shape index: {}]   ;;  %s2390_s5 = inlined_call_operand.vmem [shape: f32[1,128], index: 5, kind: input, shape index: {}]   ;;  %s2391_s6 = inlined_call_operand.vmem [shape: f32[32,128], index: 6, kind: input, shape index: {}]   ;;  %s2392_s7 = inlined_call_operand.vmem [shape: f32[1,128], index: 7, kind: input, shape index: {}]   ;;  %s2393_s8 = inlined_call_operand.vmem [shape: f32[8,128], index: 8, kind: output, shape index: {}]  }
   0x1   :  { %v38_v0 = vld [vmem:[%s2385_s1] sm:$0xff]  ;;  %v39_v1 = vld [vmem:[%s2385_s1 + $0x8] sm:$0xff]  ;;  %v40_v2 = vld [vmem:[%s2385_s1 + $0x10] sm:$0xff]  ;;  %1602 = vmatprep.subr.bf16.mxu1 %v1857_v29  ;;  %1610 = vmatprep.mubr.msk.bf16.mxu1 %vm1858_vm4, %v1857_v29  ;;  %vm261_vm5 = vcmask 523264  }
   0x2   :  { %v1765_v3 = vpack.c.bf16 %v39_v1, %v38_v0  ;;  %v41_v4 = vld [vmem:[%s2385_s1 + $0x18] sm:$0xff]  ;;  %v30_v5 = vld [vmem:[%s2386_s0] sm:$0xff]  ;;  %v31_v7 = vld [vmem:[%s2386_s0 + $0x8] sm:$0xff]  ;;  %v195_v9 = vand.u32 127, %v194_v8 }
   0x3   :  { %v1769_v6 = vpack.c.bf16 %v41_v4, %v40_v2  ;;  %1590 = vmatprep.mubr.msk.f32.mxu0 %vm49_vm0, %v30_v5  ;;  %v1928_v10 = vld [vmem:[%s2387_s3] ss:$0 sm:$0xff]  ;;  %v32_v26 = vld [vmem:[%s2386_s0 + $0x10] sm:$0xff]  ;;  %v33_v27 = vld [vmem:[%s2386_s0 + $0x18] sm:$0xff] }
   0x4   :  { %1766 = vmatprep.subr.bf16.mxu0 %v1765_v3  ;;  %vm196_vm1 = vcmp.ge.s32.totalorder %v195_v9, 64  ;;  %vm197_vm2 = vcmp.lt.s32.totalorder %v195_v9, 96  ;;  %v34_v28 = vld [vmem:[%s2386_s0 + $0x20] sm:$0xff]  ;;  %v1974_v32 = vld [vmem:[%s2389_s4 + $0x8] sm:$0xff]   ;;  %v36_v35 = vld [vmem:[%s2386_s0 + $0x30] sm:$0xff] }
   0x5   :  { %1768 = vmatpush3.bf16.msra.mxu0 %v1765_v3  ;;  %vm1933_vm3 = vmand %vm196_vm1, %vm197_vm2  ;;  %v1959_v30 = vld [vmem:[%s2388_s2] sm:$0xff]   ;;  %v35_v33 = vld [vmem:[%s2386_s0 + $0x28] sm:$0xff] }
   0x6   :  { %1770 = vmatprep.subr.bf16.mxu0 %v1769_v6  ;;  %v1966_v31 = vld [vmem:[%s2389_s4] sm:$0xff]   ;;  %v1984_v34 = vld [vmem:[%s2388_s2 + $0x8] sm:$0xff]   ;;  %v1996_v37 = vld [vmem:[%s2389_s4 + $0x10] sm:$0xff]  }
   0x7   :  { %1603 = vmatpush3.bf16.msra.mxu1 %v1966_v31  ;;  %v37_v38 = vld [vmem:[%s2386_s0 + $0x38] sm:$0xff]  ;;  %v2057_v54 = vld [vmem:[%s2390_s5] ss:$0 sm:$0xff]  ;;  %v1381_v14 = vld [vmem:[%s2391_s6 + $0x8] sm:$0xff] }
   0x8   :  { %1604 = vmatprep.subr.bf16.mxu1 %v1857_v29  ;;  %v2011_v39 = vld [vmem:[%s2389_s4 + $0x18] sm:$0xff]  }
   0x9   :  { %1772 = vmatpush3.bf16.msra.mxu0 %v1769_v6 }
   0xa   :  { %1614 = vmatprep.subr.bf16.mxu0 %v1857_v29 }
   0xb   :  { %1605 = vmatpush3.bf16.msra.mxu1 %v1974_v32 }
   0xc   :  { %1591 = vmatmul.mubr.msk.f32.vlgmr.msra.gmra.mrb[0].mxu0 %vm49_vm0, %v31_v7  ;;  %1606 = vmatprep.subr.bf16.mxu1 %v1857_v29 }
   0xd   :  { %1593 = vmatprep.mubr.msk.f32.mxu0 %vm49_vm0, %v32_v26  ;;  %1615 = vmatpush3.bf16.msra.mxu0 %v1959_v30 }
   0xe   :  { %1616 = vmatprep.subr.bf16.mxu0 %v1857_v29 }
   0xf   :  { %1607 = vmatpush3.bf16.msra.mxu1 %v1996_v37 }
  0x10   :  { %1594 = vmatmul.mubr.msk.f32.gmra.mrb[2].mxu0 %vm49_vm0, %v33_v27  ;;  %1608 = vmatprep.subr.bf16.mxu1 %v1857_v29 }
  0x11   :  { %1596 = vmatprep.mubr.msk.f32.mxu0 %vm49_vm0, %v34_v28  ;;  %1617 = vmatpush3.bf16.msra.mxu0 %v1984_v34 }
  0x12   :  { %1634 = vmatprep.subr.bf16.mxu0 %v1857_v29 }
  0x13   :  { %1609 = vmatpush3.bf16.msra.mxu1 %v2011_v39 }
  0x14   :  { %1597 = vmatmul.mubr.msk.f32.gmra.mrb[4].mxu0 %vm49_vm0, %v35_v33  ;;  %1622 = vmatprep.subr.bf16.mxu1 %v1857_v29 }
  0x15   :  { %1599 = vmatprep.mubr.msk.f32.mxu0 %vm49_vm0, %v36_v35 }
  0x18   :  { %1600 = vmatmul.mubr.msk.f32.gmra.mrb[6].mxu0 %vm49_vm0, %v37_v38 }
  0x19   :  { %1618 = vmatprep.mubr.msk.bf16.mxu0 %vm1858_vm4, %v1857_v29 }
  0xdf   :  { %v1930_v11 = vpop.f32.mrb[0].mxu0 }
  0xe0   :  { %v140_v12 = vpop.f32.mrb[1].mxu0  ;;  %v146_v53 = vadd.f32 %v1930_v11, %v1928_v10 }
  0xe1   :  { %v141_v13 = vadd.f32 %v1928_v10, %v140_v12 }
  0xe3   :  { %v200_v15 = vmul.f32 0.5, %v141_v13  ;;  %v2021_v43 = vpop.f32.mrb[2].mxu0 }
  0xe4   :  { %v2023_v44 = vpop.f32.mrb[3].mxu0 }
  0xe5   :  { %v201_v16 = vsel %vm1933_vm3, %v141_v13, %v200_v15 }
  0xe6   :  { %1790 = vtanh.f32 %v201_v16 }
  0xe7   :  { %v2025_v45 = vpop.f32.mrb[4].mxu0 }
  0xe8   :  { %v2027_v46 = vpop.f32.mrb[5].mxu0 }
  0xeb   :  { %v2029_v47 = vpop.f32.mrb[6].mxu0 }
  0xec   :  { %v2031_v48 = vpop.f32.mrb[7].mxu0 }
  0xf0   :  { %v1791_v17 = vpop.eup %1790 }
  0xf1   :  { %v203_v18 = vmul.f32 0.5, %v1791_v17 }
  0xf3   :  { %v204_v19 = vadd.f32 0.5, %v203_v18 }
  0xf5   :  { %v205_v20 = vsel %vm1933_vm3, %v1791_v17, %v204_v19 }
  0xf6   :  { %208 = vrot.lane.b32.xlu0 %v205_v20, %s1855_s18  ;;  %v206_v23 = vmul.f32 0.0, %v205_v20 }
 0x168   :  { %v209_v21 = vpop.permute.xlu0 %208 }
 0x169   :  { %v211_v22 = vmul.f32 %v209_v21, %v205_v20 }
 0x16b   :  { %213 = vrot.lane.b32.xlu0 %v211_v22, %s1856_s19 }
 0x1dd   :  { %v214_v24 = vpop.permute.xlu0 %213 }
 0x1de   :  { %v1943_v25 = vadd.f32 %v214_v24, %v206_v23 }
 0x1e0   :  { %1792 = vtanh.f32 %v1943_v25 }
 0x1ea   :  { %v1793_v36 = vpop.eup %1792 }
 0x1eb   :  { %219 = vrot.lane.b32.xlu1 %v1793_v36, %s1855_s18 }
 0x25d   :  { %v220_v40 = vpop.permute.xlu1 %219 }
 0x25e   :  { %v222_v41 = vmul.f32 %v220_v40, %v205_v20 }
 0x260   :  { %v306_v42 = vpack.c.bf16 %v222_v41, %v222_v41  ;;  %224 = vrot.lane.b32.xlu1 %v222_v41, %s1856_s19 }
 0x262   :  { %312 = vrot.lane.b32.xlu0 %v306_v42, %s1856_s19 }
 0x2d2   :  { %v225_v49 = vpop.permute.xlu1 %224 }
 0x2d3   :  { %v227_v50 = vsel %vm49_vm0, %v225_v49, 0.0 }
 0x2d4   :  { %v228_v51 = vpack.c.bf16 %v227_v50, %v227_v50  ;;  %v313_v52 = vpop.permute.xlu0 %312  ;;  %v151_v50 = vadd.f32 %v1928_v10, %v2023_v44 }
 0x2d5   :  { %1619 = vmatmul.mubr.msk.bf16.vlgmr.msra.gmra.mrb[8].mxu0 %vm49_vm0, %v313_v52 }
 0x2d6   :  { %1611 = vmatmul.mubr.msk.bf16.vlgmr.msra.gmra.mrb[0].mxu1 %vm261_vm5, %v228_v51  ;;  %1635 = vmatpush3.bf16.msra.mxu0 %v1959_v30 }
 0x2d7   :  { %1623 = vmatpush3.bf16.msra.mxu1 %v1966_v31  ;;  %1636 = vmatprep.subr.bf16.mxu0 %v1857_v29 }
 0x2d8   :  { %1624 = vmatprep.subr.bf16.mxu1 %v1857_v29  ;;  %1630 = vmatprep.mubr.msk.bf16.mxu1 %vm1858_vm4, %v1857_v29 }
 0x2d9   :  { %1638 = vmatprep.mubr.msk.bf16.mxu0 %vm1858_vm4, %v1857_v29 }
 0x2da   :  { %1637 = vmatpush3.bf16.msra.mxu0 %v1984_v34 }
 0x2db   :  { %1625 = vmatpush3.bf16.msra.mxu1 %v1974_v32  ;;  %1642 = vmatprep.subr.bf16.mxu0 %v1857_v29 }
 0x2dc   :  { %1626 = vmatprep.subr.bf16.mxu1 %v1857_v29 }
 0x2df   :  { %1627 = vmatpush3.bf16.msra.mxu1 %v1996_v37 }
 0x2e0   :  { %1628 = vmatprep.subr.bf16.mxu1 %v1857_v29 }
 0x2e3   :  { %1629 = vmatpush3.bf16.msra.mxu1 %v2011_v39 }
 0x2e4   :  { %1654 = vmatprep.subr.bf16.mxu1 %v1857_v29 }
 0x3a8   :  { %v363_v55 = vpop.f32.mrb[8].mxu0 }
 0x3a9   :  { %v369_v56 = vadd.f32 %v363_v55, %v146_v53  ;;  %v299_v57 = vpop.f32.mrb[0].mxu1  ;;  %v1620_v58 = vpop.f32.mrb[9].mxu0 }
 0x3aa   :  { %v300_v59 = vadd.f32 %v2057_v54, %v299_v57  ;;  %v1612_v60 = vpop.f32.mrb[1].mxu1  ;;  %v366_v61 = vpop.f32.mrb[10].mxu0 }
 0x3ab   :  { %v393_v62 = vmul.f32 0.5, %v369_v56  ;;  %v302_v63 = vpop.f32.mrb[2].mxu1  ;;  %v1621_v0 = vpop.f32.mrb[11].mxu0 }
 0x3ac   :  { %v370_v1 = vmul.f32 0.5, %v300_v59  ;;  %v1613_v2 = vpop.f32.mrb[3].mxu1 }
 0x3ad   :  { %v394_v3 = vsel %vm1933_vm3, %v369_v56, %v393_v62 }
 0x3ae   :  { %1794 = vtanh.f32 %v394_v3  ;;  %v371_v4 = vsel %vm1933_vm3, %v300_v59, %v370_v1 }
 0x3af   :  { %1796 = vtanh.f32 %v371_v4 }
 0x3b8   :  { %v1795_v5 = vpop.eup %1794 }
 0x3b9   :  { %v1797_v6 = vpop.eup %1796  ;;  %v396_v7 = vmul.f32 0.5, %v1795_v5 }
 0x3ba   :  { %v373_v8 = vmul.f32 0.5, %v1797_v6 }
 0x3bb   :  { %v397_v9 = vadd.f32 0.5, %v396_v7 }
 0x3bc   :  { %v374_v11 = vadd.f32 0.5, %v373_v8 }
 0x3bd   :  { %v398_v12 = vsel %vm1933_vm3, %v1795_v5, %v397_v9 }
 0x3be   :  { %401 = vrot.lane.b32.xlu0 %v398_v12, %s1855_s18  ;;  %v375_v13 = vsel %vm1933_vm3, %v1797_v6, %v374_v11  ;;  %v399_v19 = vmul.f32 %v398_v12, %v1943_v25 }
 0x3bf   :  { %378 = vrot.lane.b32.xlu1 %v375_v13, %s1855_s18  ;;  %v376_v21 = vmul.f32 0.0, %v375_v13 }
 0x430   :  { %v402_v15 = vpop.permute.xlu0 %401 }
 0x431   :  { %v404_v16 = vmul.f32 %v402_v15, %v398_v12  ;;  %v379_v17 = vpop.permute.xlu1 %378 }
 0x432   :  { %v381_v18 = vmul.f32 %v379_v17, %v375_v13 }
 0x433   :  { %406 = vrot.lane.b32.xlu0 %v404_v16, %s1856_s19 }
 0x434   :  { %383 = vrot.lane.b32.xlu1 %v381_v18, %s1856_s19 }
 0x4a5   :  { %v407_v20 = vpop.permute.xlu0 %406 }
 0x4a6   :  { %v2073_v22 = vadd.f32 %v407_v20, %v399_v19  ;;  %v384_v23 = vpop.permute.xlu1 %383 }
 0x4a7   :  { %v2075_v24 = vadd.f32 %v384_v23, %v376_v21 }
 0x4a8   :  { %1798 = vtanh.f32 %v2073_v22 }
 0x4a9   :  { %1800 = vtanh.f32 %v2075_v24 }
 0x4b2   :  { %v1799_v26 = vpop.eup %1798 }
 0x4b3   :  { %v1801_v27 = vpop.eup %1800  ;;  %412 = vrot.lane.b32.xlu0 %v1799_v26, %s1855_s18 }
 0x4b4   :  { %389 = vrot.lane.b32.xlu1 %v1801_v27, %s1855_s18 }
 0x525   :  { %v413_v28 = vpop.permute.xlu0 %412 }
 0x526   :  { %v415_v33 = vmul.f32 %v413_v28, %v398_v12  ;;  %v390_v25 = vpop.permute.xlu1 %389 }
 0x527   :  { %v392_v35 = vmul.f32 %v390_v25, %v375_v13 }
 0x528   :  { %417 = vrot.lane.b32.xlu1 %v415_v33, %s1856_s19  ;;  %v470_v36 = vpack.c.bf16 %v415_v33, %v415_v33 }
 0x529   :  { %421 = vrot.lane.b32.xlu0 %v392_v35, %s1855_s18 }
 0x52c   :  { %472 = vrot.lane.b32.xlu1 %v470_v36, %s1856_s19 }
 0x59a   :  { %v418_v38 = vpop.permute.xlu1 %417 }
 0x59b   :  { %v422_v40 = vpop.permute.xlu0 %421 }
 0x59c   :  { %v424_v41 = vsel %vm49_vm0, %v418_v38, %v422_v40  ;;  %v156_v40 = vadd.f32 %v2021_v43, %v1928_v10 }
 0x59d   :  { %v425_v42 = vpack.c.bf16 %v424_v41, %v424_v41 }
 0x59e   :  { %v473_v49 = vpop.permute.xlu1 %472 }
 0x59f   :  { %1631 = vmatmul.mubr.msk.bf16.vlgmr.msra.gmra.mrb[4].mxu1 %vm261_vm5, %v425_v42  ;;  %1639 = vmatmul.mubr.msk.bf16.vlgmr.msra.gmra.mrb[12].mxu0 %vm49_vm0, %v473_v49 }
 0x5a0   :  { %1643 = vmatpush3.bf16.msra.mxu0 %v1966_v31  ;;  %1655 = vmatpush3.bf16.msra.mxu1 %v1959_v30 }
 0x5a1   :  { %1644 = vmatprep.subr.bf16.mxu0 %v1857_v29  ;;  %1656 = vmatprep.subr.bf16.mxu1 %v1857_v29 }
 0x5a2   :  { %1650 = vmatprep.mubr.msk.bf16.mxu0 %vm1858_vm4, %v1857_v29  ;;  %1658 = vmatprep.mubr.msk.bf16.mxu1 %vm1858_vm4, %v1857_v29 }
 0x5a4   :  { %1645 = vmatpush3.bf16.msra.mxu0 %v1974_v32  ;;  %1657 = vmatpush3.bf16.msra.mxu1 %v1984_v34 }
 0x5a5   :  { %1646 = vmatprep.subr.bf16.mxu0 %v1857_v29  ;;  %1662 = vmatprep.subr.bf16.mxu1 %v1857_v29 }
 0x5a8   :  { %1647 = vmatpush3.bf16.msra.mxu0 %v1996_v37 }
 0x5a9   :  { %1648 = vmatprep.subr.bf16.mxu0 %v1857_v29 }
 0x5ac   :  { %1649 = vmatpush3.bf16.msra.mxu0 %v2011_v39 }
 0x5ad   :  { %1674 = vmatprep.subr.bf16.mxu0 %v1857_v29 }
 0x672   :  { %v463_v51 = vpop.f32.mrb[4].mxu1  ;;  %v511_v52 = vpop.f32.mrb[12].mxu0 }
 0x673   :  { %v464_v53 = vadd.f32 %v2057_v54, %v463_v51  ;;  %v517_v55 = vadd.f32 %v511_v52, %v151_v50  ;;  %v1632_v56 = vpop.f32.mrb[5].mxu1  ;;  %v1640_v57 = vpop.f32.mrb[13].mxu0 }
 0x674   :  { %v466_v58 = vpop.f32.mrb[6].mxu1  ;;  %v514_v59 = vpop.f32.mrb[14].mxu0 }
 0x675   :  { %v518_v60 = vmul.f32 0.5, %v464_v53  ;;  %v541_v61 = vmul.f32 0.5, %v517_v55  ;;  %v1633_v62 = vpop.f32.mrb[7].mxu1  ;;  %v1641_v63 = vpop.f32.mrb[15].mxu0 }
 0x677   :  { %v519_v0 = vsel %vm1933_vm3, %v464_v53, %v518_v60  ;;  %v542_v1 = vsel %vm1933_vm3, %v517_v55, %v541_v61 }
 0x678   :  { %1802 = vtanh.f32 %v519_v0 }
 0x679   :  { %1804 = vtanh.f32 %v542_v1 }
 0x682   :  { %v1803_v44 = vpop.eup %1802 }
 0x683   :  { %v1805_v2 = vpop.eup %1804  ;;  %v521_v3 = vmul.f32 0.5, %v1803_v44 }
 0x684   :  { %v544_v4 = vmul.f32 0.5, %v1805_v2 }
 0x685   :  { %v522_v5 = vadd.f32 0.5, %v521_v3 }
 0x686   :  { %v545_v6 = vadd.f32 0.5, %v544_v4 }
 0x687   :  { %v523_v7 = vsel %vm1933_vm3, %v1803_v44, %v522_v5 }
 0x688   :  { %526 = vrot.lane.b32.xlu0 %v523_v7, %s1855_s18  ;;  %v546_v8 = vsel %vm1933_vm3, %v1805_v2, %v545_v6  ;;  %v524_v15 = vmul.f32 %v523_v7, %v2075_v24 }
 0x689   :  { %549 = vrot.lane.b32.xlu1 %v546_v8, %s1855_s18  ;;  %v547_v17 = vmul.f32 %v546_v8, %v2073_v22 }
 0x6fa   :  { %v527_v9 = vpop.permute.xlu0 %526 }
 0x6fb   :  { %v529_v11 = vmul.f32 %v527_v9, %v523_v7  ;;  %v550_v12 = vpop.permute.xlu1 %549 }
 0x6fc   :  { %v552_v13 = vmul.f32 %v550_v12, %v546_v8 }
 0x6fd   :  { %531 = vrot.lane.b32.xlu0 %v529_v11, %s1856_s19 }
 0x6fe   :  { %554 = vrot.lane.b32.xlu1 %v552_v13, %s1856_s19 }
 0x76f   :  { %v532_v16 = vpop.permute.xlu0 %531 }
 0x770   :  { %v2120_v18 = vadd.f32 %v532_v16, %v524_v15  ;;  %v555_v19 = vpop.permute.xlu1 %554 }
 0x771   :  { %v2122_v20 = vadd.f32 %v555_v19, %v547_v17 }
 0x772   :  { %1806 = vtanh.f32 %v2120_v18 }
 0x773   :  { %1808 = vtanh.f32 %v2122_v20 }
 0x77c   :  { %v1807_v21 = vpop.eup %1806 }
 0x77d   :  { %v1809_v23 = vpop.eup %1808  ;;  %537 = vrot.lane.b32.xlu0 %v1807_v21, %s1855_s18 }
 0x77e   :  { %560 = vrot.lane.b32.xlu1 %v1809_v23, %s1855_s18 }
 0x7ef   :  { %v538_v26 = vpop.permute.xlu0 %537 }
 0x7f0   :  { %v540_v24 = vmul.f32 %v538_v26, %v523_v7  ;;  %v561_v27 = vpop.permute.xlu1 %560 }
 0x7f1   :  { %v563_v28 = vmul.f32 %v561_v27, %v546_v8 }
 0x7f2   :  { %569 = vrot.lane.b32.xlu1 %v540_v24, %s1855_s18 }
 0x7f3   :  { %565 = vrot.lane.b32.xlu0 %v563_v28, %s1856_s19  ;;  %v618_v22 = vpack.c.bf16 %v563_v28, %v563_v28 }
 0x7f7   :  { %620 = vrot.lane.b32.xlu0 %v618_v22, %s1856_s19 }
 0x864   :  { %v570_v33 = vpop.permute.xlu1 %569 }
 0x865   :  { %v566_v25 = vpop.permute.xlu0 %565 }
 0x866   :  { %v572_v35 = vsel %vm49_vm0, %v566_v25, %v570_v33  ;;  %v161_v33 = vadd.f32 %v1928_v10, %v2027_v46 }
 0x867   :  { %v573_v36 = vpack.c.bf16 %v572_v35, %v572_v35 }
 0x869   :  { %v621_v38 = vpop.permute.xlu0 %620  ;;  %1651 = vmatmul.mubr.msk.bf16.vlgmr.msra.gmra.mrb[16].mxu0 %vm261_vm5, %v573_v36 }
 0x86a   :  { %1659 = vmatmul.mubr.msk.bf16.vlgmr.msra.gmra.mrb[8].mxu1 %vm49_vm0, %v621_v38  ;;  %1675 = vmatpush3.bf16.msra.mxu0 %v1959_v30 }
 0x86b   :  { %1663 = vmatpush3.bf16.msra.mxu1 %v1966_v31  ;;  %1676 = vmatprep.subr.bf16.mxu0 %v1857_v29 }
 0x86c   :  { %1664 = vmatprep.subr.bf16.mxu1 %v1857_v29  ;;  %1670 = vmatprep.mubr.msk.bf16.mxu1 %vm1858_vm4, %v1857_v29 }
 0x86d   :  { %1678 = vmatprep.mubr.msk.bf16.mxu0 %vm1858_vm4, %v1857_v29 }
 0x86e   :  { %1677 = vmatpush3.bf16.msra.mxu0 %v1984_v34 }
 0x86f   :  { %1665 = vmatpush3.bf16.msra.mxu1 %v1974_v32  ;;  %1682 = vmatprep.subr.bf16.mxu0 %v1857_v29 }
 0x870   :  { %1666 = vmatprep.subr.bf16.mxu1 %v1857_v29 }
 0x873   :  { %1667 = vmatpush3.bf16.msra.mxu1 %v1996_v37 }
 0x874   :  { %1668 = vmatprep.subr.bf16.mxu1 %v1857_v29 }
 0x877   :  { %1669 = vmatpush3.bf16.msra.mxu1 %v2011_v39 }
 0x878   :  { %1694 = vmatprep.subr.bf16.mxu1 %v1857_v29 }
 0x93c   :  { %v611_v41 = vpop.f32.mrb[16].mxu0 }
 0x93d   :  { %v612_v42 = vadd.f32 %v2057_v54, %v611_v41  ;;  %v1652_v49 = vpop.f32.mrb[17].mxu0  ;;  %v659_v50 = vpop.f32.mrb[8].mxu1 }
 0x93e   :  { %v665_v51 = vadd.f32 %v659_v50, %v156_v40  ;;  %v614_v52 = vpop.f32.mrb[18].mxu0  ;;  %v1660_v53 = vpop.f32.mrb[9].mxu1 }
 0x93f   :  { %v666_v55 = vmul.f32 0.5, %v612_v42  ;;  %v1653_v56 = vpop.f32.mrb[19].mxu0  ;;  %v662_v57 = vpop.f32.mrb[10].mxu1 }
 0x940   :  { %v689_v58 = vmul.f32 0.5, %v665_v51  ;;  %v1661_v59 = vpop.f32.mrb[11].mxu1 }
 0x941   :  { %v667_v60 = vsel %vm1933_vm3, %v612_v42, %v666_v55 }
 0x942   :  { %1810 = vtanh.f32 %v667_v60  ;;  %v690_v43 = vsel %vm1933_vm3, %v665_v51, %v689_v58 }
 0x943   :  { %1812 = vtanh.f32 %v690_v43 }
 0x94c   :  { %v1811_v61 = vpop.eup %1810 }
 0x94d   :  { %v1813_v62 = vpop.eup %1812  ;;  %v669_v63 = vmul.f32 0.5, %v1811_v61 }
 0x94e   :  { %v692_v0 = vmul.f32 0.5, %v1813_v62 }
 0x94f   :  { %v670_v1 = vadd.f32 0.5, %v669_v63 }
 0x950   :  { %v693_v44 = vadd.f32 0.5, %v692_v0 }
 0x951   :  { %v671_v2 = vsel %vm1933_vm3, %v1811_v61, %v670_v1 }
 0x952   :  { %674 = vrot.lane.b32.xlu1 %v671_v2, %s1855_s18  ;;  %v694_v3 = vsel %vm1933_vm3, %v1813_v62, %v693_v44  ;;  %v672_v8 = vmul.f32 %v671_v2, %v2120_v18 }
 0x953   :  { %697 = vrot.lane.b32.xlu0 %v694_v3, %s1855_s18  ;;  %v695_v11 = vmul.f32 %v694_v3, %v2122_v20 }
 0x9c4   :  { %v675_v4 = vpop.permute.xlu1 %674 }
 0x9c5   :  { %v677_v5 = vmul.f32 %v675_v4, %v671_v2  ;;  %v698_v6 = vpop.permute.xlu0 %697 }
 0x9c6   :  { %v700_v7 = vmul.f32 %v698_v6, %v694_v3 }
 0x9c7   :  { %679 = vrot.lane.b32.xlu1 %v677_v5, %s1856_s19 }
 0x9c8   :  { %702 = vrot.lane.b32.xlu0 %v700_v7, %s1856_s19 }
 0xa39   :  { %v680_v9 = vpop.permute.xlu1 %679 }
 0xa3a   :  { %v2167_v12 = vadd.f32 %v680_v9, %v672_v8  ;;  %v703_v13 = vpop.permute.xlu0 %702 }
 0xa3b   :  { %v2169_v15 = vadd.f32 %v703_v13, %v695_v11 }
 0xa3c   :  { %1814 = vtanh.f32 %v2167_v12 }
 0xa3d   :  { %1816 = vtanh.f32 %v2169_v15 }
 0xa46   :  { %v1815_v16 = vpop.eup %1814 }
 0xa47   :  { %v1817_v17 = vpop.eup %1816  ;;  %685 = vrot.lane.b32.xlu1 %v1815_v16, %s1855_s18 }
 0xa48   :  { %708 = vrot.lane.b32.xlu0 %v1817_v17, %s1855_s18 }
 0xab9   :  { %v686_v19 = vpop.permute.xlu1 %685 }
 0xaba   :  { %v688_v18 = vmul.f32 %v686_v19, %v671_v2  ;;  %v709_v21 = vpop.permute.xlu0 %708 }
 0xabb   :  { %v711_v23 = vmul.f32 %v709_v21, %v694_v3 }
 0xabc   :  { %717 = vrot.lane.b32.xlu0 %v688_v18, %s1855_s18 }
 0xabd   :  { %713 = vrot.lane.b32.xlu1 %v711_v23, %s1856_s19  ;;  %v766_v20 = vpack.c.bf16 %v711_v23, %v711_v23 }
 0xac1   :  { %768 = vrot.lane.b32.xlu1 %v766_v20, %s1856_s19  ;;  %v166_v20 = vadd.f32 %v2025_v45, %v1928_v10 }
 0xb2e   :  { %v718_v26 = vpop.permute.xlu0 %717 }
 0xb2f   :  { %v714_v24 = vpop.permute.xlu1 %713 }
 0xb30   :  { %v720_v27 = vsel %vm49_vm0, %v714_v24, %v718_v26 }
 0xb31   :  { %v721_v28 = vpack.c.bf16 %v720_v27, %v720_v27 }
 0xb33   :  { %1671 = vmatmul.mubr.msk.bf16.vlgmr.msra.gmra.mrb[12].mxu1 %vm261_vm5, %v721_v28  ;;  %v769_v22 = vpop.permute.xlu1 %768 }
 0xb34   :  { %1679 = vmatmul.mubr.msk.bf16.vlgmr.msra.gmra.mrb[20].mxu0 %vm49_vm0, %v769_v22  ;;  %1695 = vmatpush3.bf16.msra.mxu1 %v1959_v30 }
 0xb35   :  { %1683 = vmatpush3.bf16.msra.mxu0 %v1966_v31  ;;  %1696 = vmatprep.subr.bf16.mxu1 %v1857_v29 }
 0xb36   :  { %1684 = vmatprep.subr.bf16.mxu0 %v1857_v29  ;;  %1690 = vmatprep.mubr.msk.bf16.mxu0 %vm1858_vm4, %v1857_v29 }
 0xb37   :  { %1698 = vmatprep.mubr.msk.bf16.mxu1 %vm1858_vm4, %v1857_v29 }
 0xb38   :  { %1697 = vmatpush3.bf16.msra.mxu1 %v1984_v34 }
 0xb39   :  { %1685 = vmatpush3.bf16.msra.mxu0 %v1974_v32  ;;  %1702 = vmatprep.subr.bf16.mxu1 %v1857_v29 }
 0xb3a   :  { %1686 = vmatprep.subr.bf16.mxu0 %v1857_v29 }
 0xb3d   :  { %1687 = vmatpush3.bf16.msra.mxu0 %v1996_v37 }
 0xb3e   :  { %1688 = vmatprep.subr.bf16.mxu0 %v1857_v29 }
 0xb41   :  { %1689 = vmatpush3.bf16.msra.mxu0 %v2011_v39 }
 0xb42   :  { %1714 = vmatprep.subr.bf16.mxu0 %v1857_v29 }
 0xc06   :  { %v759_v25 = vpop.f32.mrb[12].mxu1 }
 0xc07   :  { %v760_v35 = vadd.f32 %v2057_v54, %v759_v25  ;;  %v1672_v36 = vpop.f32.mrb[13].mxu1  ;;  %v807_v38 = vpop.f32.mrb[20].mxu0 }
 0xc08   :  { %v813_v40 = vadd.f32 %v807_v38, %v161_v33  ;;  %v762_v41 = vpop.f32.mrb[14].mxu1  ;;  %v1680_v42 = vpop.f32.mrb[21].mxu0 }
 0xc09   :  { %v814_v49 = vmul.f32 0.5, %v760_v35  ;;  %v1673_v50 = vpop.f32.mrb[15].mxu1  ;;  %v810_v51 = vpop.f32.mrb[22].mxu0 }
 0xc0a   :  { %v837_v52 = vmul.f32 0.5, %v813_v40  ;;  %v1681_v53 = vpop.f32.mrb[23].mxu0 }
 0xc0b   :  { %v815_v55 = vsel %vm1933_vm3, %v760_v35, %v814_v49 }
 0xc0c   :  { %1818 = vtanh.f32 %v815_v55  ;;  %v838_v46 = vsel %vm1933_vm3, %v813_v40, %v837_v52 }
 0xc0d   :  { %1820 = vtanh.f32 %v838_v46 }
 0xc16   :  { %v1819_v56 = vpop.eup %1818 }
 0xc17   :  { %v1821_v57 = vpop.eup %1820  ;;  %v817_v58 = vmul.f32 0.5, %v1819_v56 }
 0xc18   :  { %v840_v59 = vmul.f32 0.5, %v1821_v57 }
 0xc19   :  { %v818_v60 = vadd.f32 0.5, %v817_v58 }
 0xc1a   :  { %v841_v43 = vadd.f32 0.5, %v840_v59 }
 0xc1b   :  { %v819_v61 = vsel %vm1933_vm3, %v1819_v56, %v818_v60 }
 0xc1c   :  { %822 = vrot.lane.b32.xlu0 %v819_v61, %s1855_s18  ;;  %v842_v62 = vsel %vm1933_vm3, %v1821_v57, %v841_v43  ;;  %v820_v2 = vmul.f32 %v819_v61, %v2167_v12 }
 0xc1d   :  { %845 = vrot.lane.b32.xlu1 %v842_v62, %s1855_s18  ;;  %v843_v4 = vmul.f32 %v842_v62, %v2169_v15 }
 0xc8e   :  { %v823_v63 = vpop.permute.xlu0 %822 }
 0xc8f   :  { %v825_v0 = vmul.f32 %v823_v63, %v819_v61  ;;  %v846_v1 = vpop.permute.xlu1 %845 }
 0xc90   :  { %v848_v44 = vmul.f32 %v846_v1, %v842_v62 }
 0xc91   :  { %827 = vrot.lane.b32.xlu0 %v825_v0, %s1856_s19 }
 0xc92   :  { %850 = vrot.lane.b32.xlu1 %v848_v44, %s1856_s19 }
 0xd03   :  { %v828_v3 = vpop.permute.xlu0 %827 }
 0xd04   :  { %v2214_v5 = vadd.f32 %v828_v3, %v820_v2  ;;  %v851_v6 = vpop.permute.xlu1 %850 }
 0xd05   :  { %v2216_v7 = vadd.f32 %v851_v6, %v843_v4 }
 0xd06   :  { %1822 = vtanh.f32 %v2214_v5 }
 0xd07   :  { %1824 = vtanh.f32 %v2216_v7 }
 0xd10   :  { %v1823_v8 = vpop.eup %1822 }
 0xd11   :  { %v1825_v9 = vpop.eup %1824  ;;  %833 = vrot.lane.b32.xlu0 %v1823_v8, %s1855_s18 }
 0xd12   :  { %856 = vrot.lane.b32.xlu1 %v1825_v9, %s1855_s18 }
 0xd83   :  { %v834_v11 = vpop.permute.xlu0 %833 }
 0xd84   :  { %v836_v12 = vmul.f32 %v834_v11, %v819_v61  ;;  %v857_v13 = vpop.permute.xlu1 %856 }
 0xd85   :  { %v859_v16 = vmul.f32 %v857_v13, %v842_v62 }
 0xd86   :  { %865 = vrot.lane.b32.xlu1 %v836_v12, %s1855_s18 }
 0xd87   :  { %861 = vrot.lane.b32.xlu0 %v859_v16, %s1856_s19  ;;  %v914_v15 = vpack.c.bf16 %v859_v16, %v859_v16 }
 0xd8b   :  { %916 = vrot.lane.b32.xlu0 %v914_v15, %s1856_s19 }
 0xdf8   :  { %v866_v17 = vpop.permute.xlu1 %865 }
 0xdf9   :  { %v862_v19 = vpop.permute.xlu0 %861 }
 0xdfa   :  { %v868_v18 = vsel %vm49_vm0, %v862_v19, %v866_v17 }
 0xdfb   :  { %v869_v21 = vpack.c.bf16 %v868_v18, %v868_v18 }
 0xdfd   :  { %v917_v23 = vpop.permute.xlu0 %916  ;;  %1691 = vmatmul.mubr.msk.bf16.vlgmr.msra.gmra.mrb[24].mxu0 %vm261_vm5, %v869_v21 }
 0xdfe   :  { %1699 = vmatmul.mubr.msk.bf16.vlgmr.msra.gmra.mrb[16].mxu1 %vm49_vm0, %v917_v23  ;;  %1715 = vmatpush3.bf16.msra.mxu0 %v1959_v30 }
 0xdff   :  { %1703 = vmatpush3.bf16.msra.mxu1 %v1966_v31  ;;  %1716 = vmatprep.subr.bf16.mxu0 %v1857_v29 }
 0xe00   :  { %1704 = vmatprep.subr.bf16.mxu1 %v1857_v29  ;;  %1710 = vmatprep.mubr.msk.bf16.mxu1 %vm1858_vm4, %v1857_v29 }
 0xe01   :  { %1718 = vmatprep.mubr.msk.bf16.mxu0 %vm1858_vm4, %v1857_v29 }
 0xe02   :  { %1717 = vmatpush3.bf16.msra.mxu0 %v1984_v34 }
 0xe03   :  { %1705 = vmatpush3.bf16.msra.mxu1 %v1974_v32  ;;  %1722 = vmatprep.subr.bf16.mxu0 %v1857_v29 }
 0xe04   :  { %1706 = vmatprep.subr.bf16.mxu1 %v1857_v29 }
 0xe07   :  { %1707 = vmatpush3.bf16.msra.mxu1 %v1996_v37 }
 0xe08   :  { %1708 = vmatprep.subr.bf16.mxu1 %v1857_v29 }
 0xe0b   :  { %1709 = vmatpush3.bf16.msra.mxu1 %v2011_v39 }
 0xe0c   :  { %1734 = vmatprep.subr.bf16.mxu1 %v1857_v29 }
 0xed0   :  { %v907_v26 = vpop.f32.mrb[24].mxu0 }
 0xed1   :  { %v908_v24 = vadd.f32 %v2057_v54, %v907_v26  ;;  %v1692_v27 = vpop.f32.mrb[25].mxu0  ;;  %v955_v28 = vpop.f32.mrb[16].mxu1 }
 0xed2   :  { %v961_v22 = vadd.f32 %v955_v28, %v166_v20  ;;  %v910_v33 = vpop.f32.mrb[26].mxu0  ;;  %v1700_v25 = vpop.f32.mrb[17].mxu1 }
 0xed3   :  { %v962_v35 = vmul.f32 0.5, %v908_v24  ;;  %v1693_v36 = vpop.f32.mrb[27].mxu0  ;;  %v958_v38 = vpop.f32.mrb[18].mxu1 }
 0xed4   :  { %v985_v40 = vmul.f32 0.5, %v961_v22  ;;  %v1701_v41 = vpop.f32.mrb[19].mxu1 }
 0xed5   :  { %v963_v42 = vsel %vm1933_vm3, %v908_v24, %v962_v35 }
 0xed6   :  { %1826 = vtanh.f32 %v963_v42  ;;  %v986_v45 = vsel %vm1933_vm3, %v961_v22, %v985_v40 }
 0xed7   :  { %1828 = vtanh.f32 %v986_v45 }
 0xee0   :  { %v1827_v49 = vpop.eup %1826 }
 0xee1   :  { %v1829_v50 = vpop.eup %1828  ;;  %v965_v51 = vmul.f32 0.5, %v1827_v49 }
 0xee2   :  { %v988_v52 = vmul.f32 0.5, %v1829_v50 }
 0xee3   :  { %v966_v53 = vadd.f32 0.5, %v965_v51 }
 0xee4   :  { %v989_v55 = vadd.f32 0.5, %v988_v52 }
 0xee5   :  { %v967_v46 = vsel %vm1933_vm3, %v1827_v49, %v966_v53 }
 0xee6   :  { %970 = vrot.lane.b32.xlu1 %v967_v46, %s1855_s18  ;;  %v990_v56 = vsel %vm1933_vm3, %v1829_v50, %v989_v55  ;;  %v968_v43 = vmul.f32 %v967_v46, %v2214_v5 }
 0xee7   :  { %993 = vrot.lane.b32.xlu0 %v990_v56, %s1855_s18  ;;  %v991_v62 = vmul.f32 %v990_v56, %v2216_v7 }
 0xf58   :  { %v971_v57 = vpop.permute.xlu1 %970 }
 0xf59   :  { %v973_v58 = vmul.f32 %v971_v57, %v967_v46  ;;  %v994_v59 = vpop.permute.xlu0 %993 }
 0xf5a   :  { %v996_v60 = vmul.f32 %v994_v59, %v990_v56 }
 0xf5b   :  { %975 = vrot.lane.b32.xlu1 %v973_v58, %s1856_s19 }
 0xf5c   :  { %998 = vrot.lane.b32.xlu0 %v996_v60, %s1856_s19 }
 0xfcd   :  { %v976_v61 = vpop.permute.xlu1 %975 }
 0xfce   :  { %v2261_v63 = vadd.f32 %v976_v61, %v968_v43  ;;  %v999_v0 = vpop.permute.xlu0 %998 }
 0xfcf   :  { %v2263_v1 = vadd.f32 %v999_v0, %v991_v62 }
 0xfd0   :  { %1830 = vtanh.f32 %v2261_v63 }
 0xfd1   :  { %1832 = vtanh.f32 %v2263_v1 }
 0xfda   :  { %v1831_v44 = vpop.eup %1830 }
 0xfdb   :  { %v1833_v2 = vpop.eup %1832  ;;  %981 = vrot.lane.b32.xlu1 %v1831_v44, %s1855_s18 }
 0xfdc   :  { %1004 = vrot.lane.b32.xlu0 %v1833_v2, %s1855_s18  ;;  %v1854_v2 = vld [vmem:[%s2387_s3] ss:$0 sm:$0xff] }
0x104d   :  { %v982_v3 = vpop.permute.xlu1 %981 }
0x104e   :  { %v984_v4 = vmul.f32 %v982_v3, %v967_v46  ;;  %v1005_v5 = vpop.permute.xlu0 %1004 }
0x104f   :  { %v1007_v6 = vmul.f32 %v1005_v5, %v990_v56 }
0x1050   :  { %1013 = vrot.lane.b32.xlu0 %v984_v4, %s1855_s18 }
0x1051   :  { %1009 = vrot.lane.b32.xlu1 %v1007_v6, %s1856_s19  ;;  %v1062_v7 = vpack.c.bf16 %v1007_v6, %v1007_v6 }
0x1055   :  { %1064 = vrot.lane.b32.xlu1 %v1062_v7, %s1856_s19 }
0x10c2   :  { %v1014_v8 = vpop.permute.xlu0 %1013 }
0x10c3   :  { %v1010_v9 = vpop.permute.xlu1 %1009 }
0x10c4   :  { %v1016_v11 = vsel %vm49_vm0, %v1010_v9, %v1014_v8 }
0x10c5   :  { %v1017_v12 = vpack.c.bf16 %v1016_v11, %v1016_v11 }
0x10c7   :  { %1711 = vmatmul.mubr.msk.bf16.vlgmr.msra.gmra.mrb[20].mxu1 %vm261_vm5, %v1017_v12  ;;  %v1065_v13 = vpop.permute.xlu1 %1064 }
0x10c8   :  { %1719 = vmatmul.mubr.msk.bf16.vlgmr.msra.gmra.mrb[28].mxu0 %vm49_vm0, %v1065_v13  ;;  %1735 = vmatpush3.bf16.msra.mxu1 %v1959_v30  ;;  %v171_v30 = vadd.f32 %v1928_v10, %v2031_v48 }
0x10c9   :  { %1723 = vmatpush3.bf16.msra.mxu0 %v1966_v31  ;;  %1736 = vmatprep.subr.bf16.mxu1 %v1857_v29 }
0x10ca   :  { %1724 = vmatprep.subr.bf16.mxu0 %v1857_v29  ;;  %1730 = vmatprep.mubr.msk.bf16.mxu0 %vm1858_vm4, %v1857_v29 }
0x10cb   :  { %1738 = vmatprep.mubr.msk.bf16.mxu1 %vm1858_vm4, %v1857_v29 }
0x10cc   :  { %1737 = vmatpush3.bf16.msra.mxu1 %v1984_v34 }
0x10cd   :  { %1725 = vmatpush3.bf16.msra.mxu0 %v1974_v32  ;;  %1742 = vmatprep.subr.bf16.mxu1 %v1857_v29 }
0x10ce   :  { %1726 = vmatprep.subr.bf16.mxu0 %v1857_v29 }
0x10d1   :  { %1727 = vmatpush3.bf16.msra.mxu0 %v1996_v37 }
0x10d2   :  { %1728 = vmatprep.subr.bf16.mxu0 %v1857_v29 }
0x10d5   :  { %1729 = vmatpush3.bf16.msra.mxu0 %v2011_v39 }
0x119a   :  { %v1055_v16 = vpop.f32.mrb[20].mxu1 }
0x119b   :  { %v1056_v15 = vadd.f32 %v2057_v54, %v1055_v16  ;;  %v1712_v17 = vpop.f32.mrb[21].mxu1  ;;  %v1103_v34 = vpop.f32.mrb[28].mxu0 }
0x119c   :  { %v1109_v19 = vadd.f32 %v1103_v34, %v171_v30  ;;  %v1058_v18 = vpop.f32.mrb[22].mxu1  ;;  %v1720_v21 = vpop.f32.mrb[29].mxu0 }
0x119d   :  { %v1110_v23 = vmul.f32 0.5, %v1056_v15  ;;  %v1713_v20 = vpop.f32.mrb[23].mxu1  ;;  %v1106_v26 = vpop.f32.mrb[30].mxu0 }
0x119e   :  { %v1133_v24 = vmul.f32 0.5, %v1109_v19  ;;  %v1721_v27 = vpop.f32.mrb[31].mxu0 }
0x119f   :  { %v1111_v28 = vsel %vm1933_vm3, %v1056_v15, %v1110_v23 }
0x11a0   :  { %1834 = vtanh.f32 %v1111_v28  ;;  %v1134_v10 = vsel %vm1933_vm3, %v1109_v19, %v1133_v24 }
0x11a1   :  { %1836 = vtanh.f32 %v1134_v10 }
0x11aa   :  { %v1835_v48 = vpop.eup %1834 }
0x11ab   :  { %v1837_v22 = vpop.eup %1836  ;;  %v1113_v33 = vmul.f32 0.5, %v1835_v48 }
0x11ac   :  { %v1136_v25 = vmul.f32 0.5, %v1837_v22 }
0x11ad   :  { %v1114_v35 = vadd.f32 0.5, %v1113_v33 }
0x11ae   :  { %v1137_v36 = vadd.f32 0.5, %v1136_v25 }
0x11af   :  { %v1115_v38 = vsel %vm1933_vm3, %v1835_v48, %v1114_v35 }
0x11b0   :  { %1118 = vrot.lane.b32.xlu0 %v1115_v38, %s1855_s18  ;;  %v1138_v40 = vsel %vm1933_vm3, %v1837_v22, %v1137_v36  ;;  %v1116_v50 = vmul.f32 %v1115_v38, %v2261_v63 }
0x11b1   :  { %1141 = vrot.lane.b32.xlu1 %v1138_v40, %s1855_s18  ;;  %v1139_v52 = vmul.f32 %v1138_v40, %v2263_v1 }
0x1222   :  { %v1119_v41 = vpop.permute.xlu0 %1118 }
0x1223   :  { %v1121_v42 = vmul.f32 %v1119_v41, %v1115_v38  ;;  %v1142_v45 = vpop.permute.xlu1 %1141 }
0x1224   :  { %v1144_v49 = vmul.f32 %v1142_v45, %v1138_v40 }
0x1225   :  { %1123 = vrot.lane.b32.xlu0 %v1121_v42, %s1856_s19 }
0x1226   :  { %1146 = vrot.lane.b32.xlu1 %v1144_v49, %s1856_s19 }
0x1297   :  { %v1124_v51 = vpop.permute.xlu0 %1123 }
0x1298   :  { %v2307_v53 = vadd.f32 %v1124_v51, %v1116_v50  ;;  %v1147_v55 = vpop.permute.xlu1 %1146 }
0x1299   :  { %v2309_v46 = vadd.f32 %v1147_v55, %v1139_v52 }
0x129a   :  { %1838 = vtanh.f32 %v2307_v53 }
0x129b   :  { %1840 = vtanh.f32 %v2309_v46 }
0x12a4   :  { %v1839_v56 = vpop.eup %1838 }
0x12a5   :  { %v1841_v57 = vpop.eup %1840  ;;  %1129 = vrot.lane.b32.xlu0 %v1839_v56, %s1855_s18 }
0x12a6   :  { %1152 = vrot.lane.b32.xlu1 %v1841_v57, %s1855_s18 }
0x1317   :  { %v1130_v58 = vpop.permute.xlu0 %1129 }
0x1318   :  { %v1132_v59 = vmul.f32 %v1130_v58, %v1115_v38  ;;  %v1153_v60 = vpop.permute.xlu1 %1152 }
0x1319   :  { %v1155_v43 = vmul.f32 %v1153_v60, %v1138_v40 }
0x131a   :  { %1161 = vrot.lane.b32.xlu1 %v1132_v59, %s1855_s18 }
0x131b   :  { %1157 = vrot.lane.b32.xlu0 %v1155_v43, %s1856_s19  ;;  %v1210_v61 = vpack.c.bf16 %v1155_v43, %v1155_v43 }
0x131f   :  { %1212 = vrot.lane.b32.xlu0 %v1210_v61, %s1856_s19 }
0x138c   :  { %v1162_v62 = vpop.permute.xlu1 %1161 }
0x138d   :  { %v1158_v63 = vpop.permute.xlu0 %1157 }
0x138e   :  { %v1164_v0 = vsel %vm49_vm0, %v1158_v63, %v1162_v62 }
0x138f   :  { %v1165_v1 = vpack.c.bf16 %v1164_v0, %v1164_v0  ;;  %v1859_v0 = vmov 0.0|0.0  }
0x1390   :  { %1773 = vmatprep.subr.bf16.mxu0 %v1859_v0 }
0x1391   :  { %v1213_v44 = vpop.permute.xlu0 %1212  ;;  %1731 = vmatmul.mubr.msk.bf16.vlgmr.msra.gmra.mrb[32].mxu0 %vm261_vm5, %v1165_v1  ;;  %v1380_v1 = vld [vmem:[%s2391_s6] sm:$0xff] }
0x1392   :  { %1739 = vmatmul.mubr.msk.bf16.vlgmr.msra.gmra.mrb[24].mxu1 %vm49_vm0, %v1213_v44  ;;  %1762 = vmatprep.mubr.msk.f32.mxu0 %vm1858_vm4, %v1857_v29  ;;  %v1382_v44 = vld [vmem:[%s2391_s6 + $0x10] sm:$0xff] }
0x1393   :  { %1743 = vmatpush3.bf16.msra.mxu1 %v1966_v31  ;;  %1750 = vmatprep.mubr.msk.bf16.mxu1 %vm1858_vm4, %v1857_v29  ;;  %v176_v31 = vadd.f32 %v1854_v2, %v2029_v47  ;;  %v1774_v2 = vpack.c.bf16 %v1381_v14, %v1380_v1 }
0x1394   :  { %1744 = vmatprep.subr.bf16.mxu1 %v1857_v29 }
0x1395   :  { %1775 = vmatpush3.bf16.msra.mxu0 %v1774_v2 }
0x1396   :  { %1776 = vmatprep.subr.bf16.mxu0 %v1859_v0 }
0x1397   :  { %1745 = vmatpush3.bf16.msra.mxu1 %v1974_v32 }
0x1398   :  { %1746 = vmatprep.subr.bf16.mxu1 %v1857_v29 }
0x139b   :  { %1747 = vmatpush3.bf16.msra.mxu1 %v1996_v37 }
0x139c   :  { %1748 = vmatprep.subr.bf16.mxu1 %v1857_v29 }
0x139f   :  { %1749 = vmatpush3.bf16.msra.mxu1 %v2011_v39 }
0x1464   :  { %v1203_v3 = vpop.f32.mrb[32].mxu0 }
0x1465   :  { %v1204_v4 = vadd.f32 %v2057_v54, %v1203_v3  ;;  %v1732_v5 = vpop.f32.mrb[33].mxu0  ;;  %v1251_v6 = vpop.f32.mrb[24].mxu1 }
0x1466   :  { %v1257_v32 = vadd.f32 %v1251_v6, %v176_v31  ;;  %v1206_v7 = vpop.f32.mrb[34].mxu0  ;;  %v1740_v8 = vpop.f32.mrb[25].mxu1  ;;  %v1383_v31 = vld [vmem:[%s2391_s6 + $0x18] sm:$0xff] }
0x1467   :  { %v1258_v9 = vmul.f32 0.5, %v1204_v4  ;;  %v1733_v37 = vpop.f32.mrb[35].mxu0  ;;  %v1254_v11 = vpop.f32.mrb[26].mxu1  ;;  %v1777_v3 = vpack.c.bf16 %v1383_v31, %v1382_v44  ;;  %v1502_v7 = vld [vmem:[%s2392_s7] ss:$0 sm:$0xff] }
0x1468   :  { %v1281_v29 = vmul.f32 0.5, %v1257_v32  ;;  %v1741_v12 = vpop.f32.mrb[27].mxu1 }
0x1469   :  { %v1259_v39 = vsel %vm1933_vm3, %v1204_v4, %v1258_v9  ;;  %1778 = vmatpush3.bf16.msra.mxu0 %v1777_v3 }
0x146a   :  { %1842 = vtanh.f32 %v1259_v39  ;;  %v1282_v47 = vsel %vm1933_vm3, %v1257_v32, %v1281_v29 }
0x146b   :  { %1844 = vtanh.f32 %v1282_v47 }
0x1474   :  { %v1843_v13 = vpop.eup %1842 }
0x1475   :  { %v1845_v30 = vpop.eup %1844  ;;  %v1261_v16 = vmul.f32 0.5, %v1843_v13 }
0x1476   :  { %v1284_v15 = vmul.f32 0.5, %v1845_v30 }
0x1477   :  { %v1262_v17 = vadd.f32 0.5, %v1261_v16 }
0x1478   :  { %v1285_v34 = vadd.f32 0.5, %v1284_v15 }
0x1479   :  { %v1263_v19 = vsel %vm1933_vm3, %v1843_v13, %v1262_v17 }
0x147a   :  { %1266 = vrot.lane.b32.xlu1 %v1263_v19, %s1855_s18  ;;  %v1286_v18 = vsel %vm1933_vm3, %v1845_v30, %v1285_v34  ;;  %v1264_v24 = vmul.f32 %v1263_v19, %v2307_v53 }
0x147b   :  { %1289 = vrot.lane.b32.xlu0 %v1286_v18, %s1855_s18  ;;  %v1287_v28 = vmul.f32 %v1286_v18, %v2309_v46 }
0x14ec   :  { %v1267_v21 = vpop.permute.xlu1 %1266 }
0x14ed   :  { %v1269_v23 = vmul.f32 %v1267_v21, %v1263_v19  ;;  %v1290_v20 = vpop.permute.xlu0 %1289 }
0x14ee   :  { %v1292_v26 = vmul.f32 %v1290_v20, %v1286_v18 }
0x14ef   :  { %1271 = vrot.lane.b32.xlu1 %v1269_v23, %s1856_s19 }
0x14f0   :  { %1294 = vrot.lane.b32.xlu0 %v1292_v26, %s1856_s19 }
0x1561   :  { %v1272_v27 = vpop.permute.xlu1 %1271 }
0x1562   :  { %v1274_v10 = vadd.f32 %v1272_v27, %v1264_v24  ;;  %v1295_v48 = vpop.permute.xlu0 %1294 }
0x1563   :  { %v1297_v22 = vadd.f32 %v1295_v48, %v1287_v28 }
0x1564   :  { %1846 = vtanh.f32 %v1274_v10 }
0x1565   :  { %1848 = vtanh.f32 %v1297_v22 }
0x156e   :  { %v1847_v33 = vpop.eup %1846 }
0x156f   :  { %v1849_v25 = vpop.eup %1848  ;;  %1277 = vrot.lane.b32.xlu1 %v1847_v33, %s1855_s18 }
0x1570   :  { %1300 = vrot.lane.b32.xlu0 %v1849_v25, %s1855_s18 }
0x15e1   :  { %v1278_v35 = vpop.permute.xlu1 %1277 }
0x15e2   :  { %v1280_v36 = vmul.f32 %v1278_v35, %v1263_v19  ;;  %v1301_v38 = vpop.permute.xlu0 %1300 }
0x15e3   :  { %v1303_v40 = vmul.f32 %v1301_v38, %v1286_v18 }
0x15e4   :  { %1309 = vrot.lane.b32.xlu0 %v1280_v36, %s1855_s18 }
0x15e5   :  { %1305 = vrot.lane.b32.xlu1 %v1303_v40, %s1856_s19 }
0x1656   :  { %v1310_v41 = vpop.permute.xlu0 %1309 }
0x1657   :  { %v1306_v42 = vpop.permute.xlu1 %1305 }
0x1658   :  { %v1312_v45 = vsel %vm49_vm0, %v1306_v42, %v1310_v41 }
0x1659   :  { %v1313_v49 = vpack.c.bf16 %v1312_v45, %v1312_v45 }
0x165b   :  { %1751 = vmatmul.mubr.msk.bf16.vlgmr.msra.gmra.mrb[28].mxu1 %vm261_vm5, %v1313_v49 }
0x172e   :  { %v1351_v50 = vpop.f32.mrb[28].mxu1 }
0x172f   :  { %v1352_v51 = vadd.f32 %v2057_v54, %v1351_v50  ;;  %v1752_v52 = vpop.f32.mrb[29].mxu1 }
0x1730   :  { %v1354_v53 = vpop.f32.mrb[30].mxu1 }
0x1731   :  { %v1357_v55 = vmul.f32 0.5, %v1352_v51  ;;  %v1753_v46 = vpop.f32.mrb[31].mxu1 }
0x1733   :  { %v1358_v56 = vsel %vm1933_vm3, %v1352_v51, %v1357_v55 }
0x1734   :  { %1850 = vtanh.f32 %v1358_v56 }
0x173e   :  { %v1851_v57 = vpop.eup %1850 }
0x173f   :  { %v1360_v58 = vmul.f32 0.5, %v1851_v57 }
0x1741   :  { %v1361_v59 = vadd.f32 0.5, %v1360_v58 }
0x1743   :  { %v1362_v60 = vsel %vm1933_vm3, %v1851_v57, %v1361_v59 }
0x1744   :  { %1365 = vrot.lane.b32.xlu1 %v1362_v60, %s1855_s18  ;;  %v1363_v54 = vmul.f32 %v1362_v60, %v1274_v10 }
0x17b6   :  { %v1366_v43 = vpop.permute.xlu1 %1365 }
0x17b7   :  { %v1368_v61 = vmul.f32 %v1366_v43, %v1362_v60 }
0x17b9   :  { %1370 = vrot.lane.b32.xlu0 %v1368_v61, %s1856_s19 }
0x182b   :  { %v1371_v62 = vpop.permute.xlu0 %1370 }
0x182c   :  { %v1373_v63 = vadd.f32 %v1371_v62, %v1363_v54 }
0x182e   :  { %1852 = vtanh.f32 %v1373_v63 }
0x1838   :  { %v1853_v4 = vpop.eup %1852 }
0x1839   :  { %1376 = vrot.lane.b32.xlu1 %v1853_v4, %s1855_s18 }
0x18ab   :  { %v1377_v5 = vpop.permute.xlu1 %1376 }
0x18ac   :  { %v1379_v6 = vmul.f32 %v1377_v5, %v1362_v60 }
0x18ae   :  { %1392 = vrot.lane.b32.xlu0 %v1379_v6, %s1856_s19 }
0x1920   :  { %v1393_v32 = vpop.permute.xlu0 %1392 }
0x1921   :  { %1763 = vmatmul.mubr.msk.f32.vlgmr.msra.gmra.mrb[36].mxu0 %vm49_vm0, %v1393_v32 }
0x19f4   :  { %v1462_v8 = vpop.f32.mrb[36].mxu0 }
0x19f5   :  { %v1463_v9 = vadd.f32 %v1502_v7, %v1462_v8  ;;  %v1764_v37 = vpop.f32.mrb[37].mxu0 }
0x19f7   :  { %1466 = vst [vmem:[%s2393_s8] sm:$0xff] %v1463_v9 }

</bundles_post_ra>
